<compile_context>
chip_gen: v7x
topology: tpu7x:2x2x1
jax: 0.10.0
libtpu: 0.0.40
codegen_flags: <defaults>
</compile_context>

<pallas_src>
import math
from dataclasses import dataclass
from functools import partial

import jax
import jax.numpy as jnp
from jax import lax
from jax.experimental import pallas as pl
from jax.experimental.pallas import tpu as pltpu


_SQRT_HALF = 1.0 / math.sqrt(2.0)
_LANE = 128                      # lane-dense slab width for tiny heads
_MIB = 1024 * 1024


def _round_up(x, m):
    return ((x + m - 1) // m) * m


def _tpu_config():
    """Generation-aware (vmem_limit_bytes, two_tensorcores_per_chip)."""
    vmem_cap = 128 * _MIB
    try:
        info = pltpu.get_tpu_info()
        cap = getattr(info, "vmem_capacity_bytes", None)
        if cap:
            vmem_cap = int(cap)
    except Exception:
        pass
    kind = ""
    try:
        kind = jax.devices()[0].device_kind.lower()
    except Exception:
        pass
    two_tc = ("v7" in kind) or ("v5p" in kind) or ("v4" in kind)
    if "v7" in kind:
        vmem_cap = min(vmem_cap, 64 * _MIB)
    # leave headroom below physical VMEM; cap at 112 MiB on 128-MiB parts
    vmem_limit = max(32 * _MIB, min(vmem_cap - 8 * _MIB, 112 * _MIB))
    return vmem_limit, two_tc


def _gelu_layernorm(h, gamma, beta):
    """Exact (erf) GELU followed by LayerNorm(eps=1e-5); all f32 VPU/EUP math."""
    h = 0.5 * h * (1.0 + lax.erf(h * _SQRT_HALF))
    mean = jnp.mean(h, axis=-1, keepdims=True)
    cen = h - mean
    var = jnp.mean(cen * cen, axis=-1, keepdims=True)
    hn = cen * lax.rsqrt(var + 1e-5)          # rsqrt -> EUP slot; eps keeps pad rows finite
    return hn * gamma + beta


def _const_spec(block_shape, index_map, buffered):
    """BlockSpec for a constant-index operand; single-buffered when possible."""
    if buffered:
        return pl.BlockSpec(block_shape, index_map, pipeline_mode=pl.Buffered(1))
    return pl.BlockSpec(block_shape, index_map)


# ----------------------------------------------------------------------------
# Kernel 1: one large regression head, W2 fully VMEM-resident (no out_dim axis)
# ----------------------------------------------------------------------------
def _big_head_kernel(x_ref, w1_ref, b1_ref, g_ref, beta_ref, w2_ref, b2_ref,
                     o_ref):
    h = jnp.dot(x_ref[...], w1_ref[...],
                preferred_element_type=jnp.float32) + b1_ref[...]
    hn = _gelu_layernorm(h, g_ref[...], beta_ref[...])
    out = jnp.dot(hn.astype(jnp.bfloat16), w2_ref[...],
                  preferred_element_type=jnp.float32) + b2_ref[...]
    o_ref[...] = out.astype(o_ref.dtype)


def regression_head(x2d_bf16, p, *, tm, vmem_limit, out_dtype=jnp.float32):
    """x2d_bf16: (T_pad, d_model) bf16, T_pad % tm == 0.

    p holds pre-padded weights (W2/b2 padded to a multiple of 128 lanes at
    init time).  Returns (T_pad, n_pad) logits in out_dtype.
    """
    T, d = x2d_bf16.shape
    n_pad = p["W2"].shape[1]
    assert T % tm == 0 and n_pad % 128 == 0

    def make(buffered):
        cs = partial(_const_spec, buffered=buffered)
        return pl.pallas_call(
            _big_head_kernel,
            out_shape=jax.ShapeDtypeStruct((T, n_pad), out_dtype),
            grid_spec=pltpu.PrefetchScalarGridSpec(
                num_scalar_prefetch=0,
                grid=(T // tm,),
                in_specs=[
                    pl.BlockSpec((tm, d), lambda i: (i, 0)),   # x tile (pipelined)
                    cs((d, d), lambda i: (0, 0)),              # W1 (resident)
                    cs((1, d), lambda i: (0, 0)),              # b1
                    cs((1, d), lambda i: (0, 0)),              # ln gamma
                    cs((1, d), lambda i: (0, 0)),              # ln beta
                    cs((d, n_pad), lambda i: (0, 0)),          # W2 (resident)
                    cs((1, n_pad), lambda i: (0, 0)),          # b2
                ],
                out_specs=pl.BlockSpec((tm, n_pad), lambda i: (i, 0)),
            ),
            compiler_params=pltpu.CompilerParams(
                dimension_semantics=("parallel",),
                vmem_limit_bytes=vmem_limit,
            ),
        )

    args = (x2d_bf16, p["W1"], p["b1"], p["gamma"], p["beta"], p["W2"], p["b2"])
    try:
        return make(True)(*args)
    except Exception:
        # older jax without pipeline_mode / Buffered(1) -> double-buffered consts
        return make(False)(*args)


# ----------------------------------------------------------------------------
# Kernel 2: the three tiny heads fused into one call (stacked weights, each
# head's output padded to a lane-dense 128-wide slab).
# ----------------------------------------------------------------------------
def _small_heads_kernel(x_ref, w1_ref, b1_ref, g_ref, beta_ref, w2_ref, b2_ref,
                        o_ref, *, n_heads):
    x = x_ref[...]                                          # (tm, d) bf16, read once
    for h in range(n_heads):                                # static unroll
        hh = jnp.dot(x, w1_ref[h],
                     preferred_element_type=jnp.float32) + b1_ref[h]
        hn = _gelu_layernorm(hh, g_ref[h], beta_ref[h])
        out = jnp.dot(hn.astype(jnp.bfloat16), w2_ref[h],
                      preferred_element_type=jnp.float32) + b2_ref[h]
        o_ref[h] = out.astype(o_ref.dtype)                  # full 128-lane store


def fused_small_heads(x2d_bf16, sp, *, tm, vmem_limit, out_dtype=jnp.float32):
    """Returns (n_heads, T_pad, 128); head h's logits are [h, :, :out_dim_h]."""
    T, d = x2d_bf16.shape
    assert T % tm == 0
    n_heads = sp["W1"].shape[0]

    def make(buffered):
        cs = partial(_const_spec, buffered=buffered)
        return pl.pallas_call(
            partial(_small_heads_kernel, n_heads=n_heads),
            out_shape=jax.ShapeDtypeStruct((n_heads, T, _LANE), out_dtype),
            grid_spec=pltpu.PrefetchScalarGridSpec(
                num_scalar_prefetch=0,
                grid=(T // tm,),
                in_specs=[
                    pl.BlockSpec((tm, d), lambda i: (i, 0)),
                    cs((n_heads, d, d), lambda i: (0, 0, 0)),       # stacked W1
                    cs((n_heads, 1, d), lambda i: (0, 0, 0)),
                    cs((n_heads, 1, d), lambda i: (0, 0, 0)),
                    cs((n_heads, 1, d), lambda i: (0, 0, 0)),
                    cs((n_heads, d, _LANE), lambda i: (0, 0, 0)),   # stacked W2
                    cs((n_heads, 1, _LANE), lambda i: (0, 0, 0)),
                ],
                out_specs=pl.BlockSpec((n_heads, tm, _LANE), lambda i: (0, i, 0)),
            ),
            compiler_params=pltpu.CompilerParams(
                dimension_semantics=("parallel",),
                vmem_limit_bytes=vmem_limit,
            ),
        )

    args = (x2d_bf16, sp["W1"], sp["b1"], sp["gamma"], sp["beta"],
            sp["W2"], sp["b2"])
    try:
        return make(True)(*args)
    except Exception:
        return make(False)(*args)


# ----------------------------------------------------------------------------
# OutputHeads
# ----------------------------------------------------------------------------
@dataclass
class ESMOutput:
    sequence_logits: jnp.ndarray
    structure_logits: jnp.ndarray
    secondary_structure_logits: jnp.ndarray
    sasa_logits: jnp.ndarray
    function_logits: jnp.ndarray
    residue_logits: jnp.ndarray
    embeddings: jnp.ndarray


HEAD_DIMS = {
    "sequence": 64,
    "structure": 4096,
    "ss8": 8 + 3,
    "sasa": 16 + 3,
    "function": 260 * 8,
    "residue": 1478,
}
SMALL_HEADS = ("sequence", "ss8", "sasa")      # out_dim <= 128 -> fused call
BIG_HEADS = ("structure", "function", "residue")


def init_head_params(key, d_model, out_dim):
    k1, k2, k3, k4 = jax.random.split(key, 4)
    s = 1.0 / math.sqrt(d_model)
    return {
        # matmul weights stored in bf16 (MXU-native, halves weight HBM/VMEM)
        "W1": jax.random.uniform(k1, (d_model, d_model), jnp.float32, -s, s
                                 ).astype(jnp.bfloat16),
        "b1": jax.random.uniform(k2, (1, d_model), jnp.float32, -s, s),
        "gamma": jnp.ones((1, d_model), jnp.float32),
        "beta": jnp.zeros((1, d_model), jnp.float32),
        "W2": jax.random.uniform(k3, (d_model, out_dim), jnp.float32, -s, s
                                 ).astype(jnp.bfloat16),
        "b2": jax.random.uniform(k4, (1, out_dim), jnp.float32, -s, s),
    }


def init_output_heads(key, d_model):
    keys = jax.random.split(key, len(HEAD_DIMS))
    return {name: init_head_params(k, d_model, dim)
            for (name, dim), k in zip(HEAD_DIMS.items(), keys)}


def prepare_params(raw):
    """One-time weight prep (pad / stack) so no copies run every forward."""
    big = {}
    for name in BIG_HEADS:
        p = raw[name]
        out_dim = p["W2"].shape[1]
        n_pad = _round_up(out_dim, 128)
        w2, b2 = p["W2"], p["b2"]
        if n_pad != out_dim:
            w2 = jnp.pad(w2, ((0, 0), (0, n_pad - out_dim)))
            b2 = jnp.pad(b2, ((0, 0), (0, n_pad - out_dim)))
        big[name] = {"W1": p["W1"], "b1": p["b1"], "gamma": p["gamma"],
                     "beta": p["beta"], "W2": w2, "b2": b2}

    def pad_n(a):
        return jnp.pad(a, ((0, 0), (0, _LANE - a.shape[1])))

    sp = [raw[n] for n in SMALL_HEADS]
    small = {
        "W1": jnp.stack([p["W1"] for p in sp]),                   # (H,d,d) bf16
        "b1": jnp.stack([p["b1"] for p in sp]),                   # (H,1,d) f32
        "gamma": jnp.stack([p["gamma"] for p in sp]),
        "beta": jnp.stack([p["beta"] for p in sp]),
        "W2": jnp.stack([pad_n(p["W2"]) for p in sp]),            # (H,d,128) bf16
        "b2": jnp.stack([pad_n(p["b2"]) for p in sp]),            # (H,1,128) f32
    }
    return {"big": big, "small": small}


def _big_head_budget(t, d, n_pad, out_bytes):
    return (2 * t * d * 2                  # x tile, double-buffered
            + d * d * 2                    # W1 resident (single-buffered)
            + d * n_pad * 2                # W2 resident (single-buffered)
            + 6 * d * 4 + 2 * n_pad * 4    # small vectors
            + 2 * t * n_pad * out_bytes    # output tile, double-buffered
            + t * d * 4 + t * n_pad * 4)   # f32 intermediates headroom


def _small_heads_budget(t, d, n_heads):
    return (2 * t * d * 2
            + n_heads * d * d * 2
            + n_heads * d * _LANE * 2
            + 2 * n_heads * t * _LANE * 4
            + 2 * t * d * 4)


def _fit_tm(tm, budget, limit):
    while tm > 16 and budget(tm) > limit:
        tm = max(16, _round_up(tm // 2, 16))
    return tm


def output_heads_forward(params, x, embed, *, tm=None,
                         big_out_dtype=jnp.float32):
    """params: output of prepare_params().  x: (B, L, d_model) f32.

    big_out_dtype=jnp.bfloat16 halves output-side HBM traffic for the big
    heads (precision tradeoff; default f32 matches torch semantics).
    """
    B, L, d_model = x.shape
    T = B * L
    vmem_limit, two_tc = _tpu_config()

    # Token tiling: bf16 sublane packing wants multiples of 16.  Bigger tiles
    # on single-TC chips (v5e/v6e), moderate on v7x (64 MiB VMEM, 2 TCs).
    if tm is None:
        tm = 512 if two_tc else 1024
    tm_eff = min(tm, _round_up(T, 16))

    n_pad_max = max(params["big"][n]["W2"].shape[1] for n in BIG_HEADS)
    out_bytes = jnp.dtype(big_out_dtype).itemsize

    def budget(t):
        return max(_big_head_budget(t, d_model, n_pad_max, out_bytes),
                   _small_heads_budget(t, d_model, len(SMALL_HEADS)))

    tm_eff = _fit_tm(tm_eff, budget, int(vmem_limit * 0.9))
    t_pad = _round_up(T, tm_eff)
    # Only shrink for core occupancy on 2-TC chips; never on v5e/v6e.
    if two_tc and t_pad // tm_eff < 2 and tm_eff >= 32:
        tm_eff = _round_up(tm_eff // 2, 16)
        t_pad = _round_up(T, tm_eff)

    x2d = x.reshape(T, d_model).astype(jnp.bfloat16)
    if t_pad != T:
        x2d = jnp.pad(x2d, ((0, t_pad - T), (0, 0)))

    # --- tiny heads: one fused kernel, one pass over x, lane-dense outputs ---
    small = fused_small_heads(x2d, params["small"], tm=tm_eff,
                              vmem_limit=vmem_limit)

    def take_small(idx, name):
        o = small[idx]
        if t_pad != T:
            o = o[:T]
        return o[:, :HEAD_DIMS[name]].reshape(B, L, -1)

    sequence_logits = take_small(0, "sequence")
    ss8_logits = take_small(1, "ss8")
    sasa_logits = take_small(2, "sasa")

    # --- big heads: resident-W2 kernel, single token-tile grid axis ---------
    def run_big(name):
        out = regression_head(x2d, params["big"][name], tm=tm_eff,
                              vmem_limit=vmem_limit, out_dtype=big_out_dtype)
        if t_pad != T:
            out = out[:T]
        od = HEAD_DIMS[name]
        if out.shape[1] != od:          # no-op slice when out_dim % 128 == 0
            out = out[:, :od]
        return out.reshape(B, L, od)

    structure_logits = run_big("structure")
    function_logits = run_big("function").reshape(B, L, 8, 260)  # '(k v)->k v', k=8
    residue_logits = run_big("residue")

    return ESMOutput(
        sequence_logits=sequence_logits,
        structure_logits=structure_logits,
        secondary_structure_logits=ss8_logits,
        sasa_logits=sasa_logits,
        function_logits=function_logits,
        residue_logits=residue_logits,
        embeddings=embed,
    )


# ----------------------------------------------------------------------------
# Pure-JAX references for correctness checking
# ----------------------------------------------------------------------------
def _ref_head(x2d, p):
    """Same recipe as the kernel: bf16 matmul operands, f32 accumulation/math."""
    xb = x2d.astype(jnp.bfloat16)
    h = jnp.dot(xb, p["W1"], preferred_element_type=jnp.float32) + p["b1"]
    h = 0.5 * h * (1.0 + lax.erf(h * _SQRT_HALF))
    mean = jnp.mean(h, axis=-1, keepdims=True)
    var = jnp.mean((h - mean) ** 2, axis=-1, keepdims=True)
    hn = (h - mean) * lax.rsqrt(var + 1e-5) * p["gamma"] + p["beta"]
    return jnp.dot(hn.astype(jnp.bfloat16), p["W2"],
                   preferred_element_type=jnp.float32) + p["b2"]


def _ref_head_f32(x2d, p):
    """Full-f32 reference (torch semantics) -- compared with a loose tolerance."""
    h = x2d @ p["W1"].astype(jnp.float32) + p["b1"]
    h = 0.5 * h * (1.0 + lax.erf(h * _SQRT_HALF))
    mean = jnp.mean(h, axis=-1, keepdims=True)
    var = jnp.mean((h - mean) ** 2, axis=-1, keepdims=True)
    hn = (h - mean) * lax.rsqrt(var + 1e-5) * p["gamma"] + p["beta"]
    return hn @ p["W2"].astype(jnp.float32) + p["b2"]


if __name__ == "__main__":
    B, L, d_model = 2, 8, 32
    key = jax.random.PRNGKey(0)
    kx, ke, kp = jax.random.split(key, 3)

    x = jax.random.normal(kx, (B, L, d_model), jnp.float32)
    embed = jax.random.normal(ke, (B, L, d_model), jnp.float32)
    raw_params = init_output_heads(kp, d_model)
    params = prepare_params(raw_params)

    out = output_heads_forward(params, x, embed)
    jax.block_until_ready(out.sequence_logits)
    jax.block_until_ready(out.structure_logits)
    jax.block_until_ready(out.secondary_structure_logits)
    jax.block_until_ready(out.sasa_logits)
    jax.block_until_ready(out.function_logits)
    jax.block_until_ready(out.residue_logits)

    # shape checks
    assert out.sequence_logits.shape == (B, L, 64)
    assert out.structure_logits.shape == (B, L, 4096)
    assert out.secondary_structure_logits.shape == (B, L, 11)
    assert out.sasa_logits.shape == (B, L, 19)
    assert out.function_logits.shape == (B, L, 8, 260)
    assert out.residue_logits.shape == (B, L, 1478)
    assert jnp.array_equal(out.embeddings, embed)

    # numeric checks vs references
    x2d = x.reshape(B * L, d_model)
    checks = [
        ("sequence", out.sequence_logits),
        ("ss8", out.secondary_structure_logits),
        ("sasa", out.sasa_logits),
        ("structure", out.structure_logits),
        ("function", out.function_logits.reshape(B, L, -1)),
        ("residue", out.residue_logits),
    ]
    for name, got in checks:
        ref = _ref_head(x2d, raw_params[name]).reshape(B, L, -1)
        ref32 = _ref_head_f32(x2d, raw_params[name]).reshape(B, L, -1)
        assert got.shape == ref.shape, name
        # tight check against the matched (bf16-matmul) reference
        assert jnp.allclose(got, ref, atol=2e-3, rtol=2e-3), name
        # loose sanity check against the pure-f32 torch-equivalent math
        assert jnp.allclose(got, ref32, atol=1e-1, rtol=1e-1), name

    print("KERNEL_OK")
</pallas_src>

<mosaic_0001>
module attributes {stable_mosaic.version = 11 : i64} {
  func.func @_small_heads_kernel(%arg0: i32, %arg1: memref<16x32xbf16, #tpu.memory_space<vmem>>, %arg2: memref<3x32x32xbf16, #tpu.memory_space<vmem>>, %arg3: memref<3x1x32xf32, #tpu.memory_space<vmem>>, %arg4: memref<3x1x32xf32, #tpu.memory_space<vmem>>, %arg5: memref<3x1x32xf32, #tpu.memory_space<vmem>>, %arg6: memref<3x32x128xbf16, #tpu.memory_space<vmem>>, %arg7: memref<3x1x128xf32, #tpu.memory_space<vmem>>, %arg8: memref<3x16x128xf32, #tpu.memory_space<vmem>>) attributes {dimension_semantics = [#tpu.dimension_semantics<parallel>], iteration_bounds = array<i64: 1>, scalar_prefetch = 0 : i64, scratch_operands = 0 : i64, tpu.core_type = #tpu.core_type<tc>, window_params = [{transform_indices = @transform_0, window_bounds = array<i64: 16, 32>}, {pipeline_mode = #tpu.pipeline_mode<synchronous>, transform_indices = @transform_1, window_bounds = array<i64: 3, 32, 32>}, {pipeline_mode = #tpu.pipeline_mode<synchronous>, transform_indices = @transform_2, window_bounds = array<i64: 3, 1, 32>}, {pipeline_mode = #tpu.pipeline_mode<synchronous>, transform_indices = @transform_3, window_bounds = array<i64: 3, 1, 32>}, {pipeline_mode = #tpu.pipeline_mode<synchronous>, transform_indices = @transform_4, window_bounds = array<i64: 3, 1, 32>}, {pipeline_mode = #tpu.pipeline_mode<synchronous>, transform_indices = @transform_5, window_bounds = array<i64: 3, 32, 128>}, {pipeline_mode = #tpu.pipeline_mode<synchronous>, transform_indices = @transform_6, window_bounds = array<i64: 3, 1, 128>}, {transform_indices = @transform_7, window_bounds = array<i64: 3, 16, 128>}]} {
    %c0 = arith.constant 0 : index
    %c0_0 = arith.constant 0 : index
    %0 = vector.load %arg1[%c0, %c0_0] : memref<16x32xbf16, #tpu.memory_space<vmem>>, vector<16x32xbf16>
    %c0_1 = arith.constant 0 : index
    %c0_2 = arith.constant 0 : index
    %c0_3 = arith.constant 0 : index
    %1 = vector.load %arg2[%c0_1, %c0_2, %c0_3] : memref<3x32x32xbf16, #tpu.memory_space<vmem>>, vector<1x32x32xbf16>
    %2 = vector.shape_cast %1 : vector<1x32x32xbf16> to vector<32x32xbf16>
    %cst = arith.constant dense<0.000000e+00> : vector<16x32xf32>
    %3 = tpu.matmul %0, %2, %cst {dimension_numbers = #tpu.dot_dimension_numbers<[1], [0], [0], [1], [0, 0, 1, 1], [], []>} : vector<16x32xbf16>, vector<32x32xbf16>, vector<16x32xf32> -> vector<16x32xf32>
    %c0_4 = arith.constant 0 : index
    %c0_5 = arith.constant 0 : index
    %c0_6 = arith.constant 0 : index
    %4 = vector.load %arg3[%c0_4, %c0_5, %c0_6] : memref<3x1x32xf32, #tpu.memory_space<vmem>>, vector<1x1x32xf32>
    %5 = vector.shape_cast %4 : vector<1x1x32xf32> to vector<1x32xf32>
    %6 = vector.broadcast %5 : vector<1x32xf32> to vector<16x32xf32>
    %7 = arith.addf %3, %6 : vector<16x32xf32>
    %c0_7 = arith.constant 0 : index
    %c0_8 = arith.constant 0 : index
    %c0_9 = arith.constant 0 : index
    %8 = vector.load %arg4[%c0_7, %c0_8, %c0_9] : memref<3x1x32xf32, #tpu.memory_space<vmem>>, vector<1x1x32xf32>
    %9 = vector.shape_cast %8 : vector<1x1x32xf32> to vector<1x32xf32>
    %c0_10 = arith.constant 0 : index
    %c0_11 = arith.constant 0 : index
    %c0_12 = arith.constant 0 : index
    %10 = vector.load %arg5[%c0_10, %c0_11, %c0_12] : memref<3x1x32xf32, #tpu.memory_space<vmem>>, vector<1x1x32xf32>
    %11 = vector.shape_cast %10 : vector<1x1x32xf32> to vector<1x32xf32>
    %cst_13 = arith.constant 5.000000e-01 : f32
    %12 = vector.broadcast %cst_13 : f32 to vector<16x32xf32>
    %13 = arith.mulf %12, %7 : vector<16x32xf32>
    %cst_14 = arith.constant 0.707106769 : f32
    %14 = vector.broadcast %cst_14 : f32 to vector<16x32xf32>
    %15 = arith.mulf %7, %14 : vector<16x32xf32>
    %16 = math.erf %15 : vector<16x32xf32>
    %cst_15 = arith.constant 1.000000e+00 : f32
    %17 = vector.broadcast %cst_15 : f32 to vector<16x32xf32>
    %18 = arith.addf %17, %16 : vector<16x32xf32>
    %19 = arith.mulf %13, %18 : vector<16x32xf32>
    %cst_16 = arith.constant dense<0.000000e+00> : vector<16xf32>
    %20 = vector.multi_reduction <add>, %19, %cst_16 [1] : vector<16x32xf32> to vector<16xf32>
    %21 = vector.shape_cast %20 : vector<16xf32> to vector<16x1xf32>
    %cst_17 = arith.constant 3.200000e+01 : f32
    %22 = vector.broadcast %cst_17 : f32 to vector<16x1xf32>
    %23 = arith.divf %21, %22 : vector<16x1xf32>
    %24 = vector.broadcast %23 : vector<16x1xf32> to vector<16x32xf32>
    %25 = arith.subf %19, %24 : vector<16x32xf32>
    %26 = arith.mulf %25, %25 : vector<16x32xf32>
    %cst_18 = arith.constant dense<0.000000e+00> : vector<16xf32>
    %27 = vector.multi_reduction <add>, %26, %cst_18 [1] : vector<16x32xf32> to vector<16xf32>
    %28 = vector.shape_cast %27 : vector<16xf32> to vector<16x1xf32>
    %cst_19 = arith.constant 3.200000e+01 : f32
    %29 = vector.broadcast %cst_19 : f32 to vector<16x1xf32>
    %30 = arith.divf %28, %29 : vector<16x1xf32>
    %cst_20 = arith.constant 9.99999974E-6 : f32
    %31 = vector.broadcast %cst_20 : f32 to vector<16x1xf32>
    %32 = arith.addf %30, %31 : vector<16x1xf32>
    %33 = math.rsqrt %32 : vector<16x1xf32>
    %34 = vector.broadcast %33 : vector<16x1xf32> to vector<16x32xf32>
    %35 = arith.mulf %25, %34 : vector<16x32xf32>
    %36 = vector.broadcast %9 : vector<1x32xf32> to vector<16x32xf32>
    %37 = arith.mulf %35, %36 : vector<16x32xf32>
    %38 = vector.broadcast %11 : vector<1x32xf32> to vector<16x32xf32>
    %39 = arith.addf %37, %38 : vector<16x32xf32>
    %40 = arith.truncf %39 : vector<16x32xf32> to vector<16x32xbf16>
    %c0_21 = arith.constant 0 : index
    %c0_22 = arith.constant 0 : index
    %c0_23 = arith.constant 0 : index
    %41 = vector.load %arg6[%c0_21, %c0_22, %c0_23] : memref<3x32x128xbf16, #tpu.memory_space<vmem>>, vector<1x32x128xbf16>
    %42 = vector.shape_cast %41 : vector<1x32x128xbf16> to vector<32x128xbf16>
    %cst_24 = arith.constant dense<0.000000e+00> : vector<16x128xf32>
    %43 = tpu.matmul %40, %42, %cst_24 {dimension_numbers = #tpu.dot_dimension_numbers<[1], [0], [0], [1], [0, 0, 1, 1], [], []>} : vector<16x32xbf16>, vector<32x128xbf16>, vector<16x128xf32> -> vector<16x128xf32>
    %c0_25 = arith.constant 0 : index
    %c0_26 = arith.constant 0 : index
    %c0_27 = arith.constant 0 : index
    %44 = vector.load %arg7[%c0_25, %c0_26, %c0_27] : memref<3x1x128xf32, #tpu.memory_space<vmem>>, vector<1x1x128xf32>
    %45 = vector.shape_cast %44 : vector<1x1x128xf32> to vector<1x128xf32>
    %46 = vector.broadcast %45 : vector<1x128xf32> to vector<16x128xf32>
    %47 = arith.addf %43, %46 : vector<16x128xf32>
    %c0_28 = arith.constant 0 : index
    %c0_29 = arith.constant 0 : index
    %c0_30 = arith.constant 0 : index
    %48 = vector.load %arg8[%c0_28, %c0_29, %c0_30] : memref<3x16x128xf32, #tpu.memory_space<vmem>>, vector<1x16x128xf32>
    %49 = vector.shape_cast %48 : vector<1x16x128xf32> to vector<16x128xf32>
    %50 = vector.shape_cast %47 : vector<16x128xf32> to vector<1x16x128xf32>
    tpu.vector_store %arg8[%c0_28, %c0_29, %c0_30], %50 {strides = array<i32>} : memref<3x16x128xf32, #tpu.memory_space<vmem>>, vector<1x16x128xf32>,
    %c1 = arith.constant 1 : index
    %c0_31 = arith.constant 0 : index
    %c0_32 = arith.constant 0 : index
    %51 = vector.load %arg2[%c1, %c0_31, %c0_32] : memref<3x32x32xbf16, #tpu.memory_space<vmem>>, vector<1x32x32xbf16>
    %52 = vector.shape_cast %51 : vector<1x32x32xbf16> to vector<32x32xbf16>
    %cst_33 = arith.constant dense<0.000000e+00> : vector<16x32xf32>
    %53 = tpu.matmul %0, %52, %cst_33 {dimension_numbers = #tpu.dot_dimension_numbers<[1], [0], [0], [1], [0, 0, 1, 1], [], []>} : vector<16x32xbf16>, vector<32x32xbf16>, vector<16x32xf32> -> vector<16x32xf32>
    %c1_34 = arith.constant 1 : index
    %c0_35 = arith.constant 0 : index
    %c0_36 = arith.constant 0 : index
    %54 = vector.load %arg3[%c1_34, %c0_35, %c0_36] : memref<3x1x32xf32, #tpu.memory_space<vmem>>, vector<1x1x32xf32>
    %55 = vector.shape_cast %54 : vector<1x1x32xf32> to vector<1x32xf32>
    %56 = vector.broadcast %55 : vector<1x32xf32> to vector<16x32xf32>
    %57 = arith.addf %53, %56 : vector<16x32xf32>
    %c1_37 = arith.constant 1 : index
    %c0_38 = arith.constant 0 : index
    %c0_39 = arith.constant 0 : index
    %58 = vector.load %arg4[%c1_37, %c0_38, %c0_39] : memref<3x1x32xf32, #tpu.memory_space<vmem>>, vector<1x1x32xf32>
    %59 = vector.shape_cast %58 : vector<1x1x32xf32> to vector<1x32xf32>
    %c1_40 = arith.constant 1 : index
    %c0_41 = arith.constant 0 : index
    %c0_42 = arith.constant 0 : index
    %60 = vector.load %arg5[%c1_40, %c0_41, %c0_42] : memref<3x1x32xf32, #tpu.memory_space<vmem>>, vector<1x1x32xf32>
    %61 = vector.shape_cast %60 : vector<1x1x32xf32> to vector<1x32xf32>
    %cst_43 = arith.constant 5.000000e-01 : f32
    %62 = vector.broadcast %cst_43 : f32 to vector<16x32xf32>
    %63 = arith.mulf %62, %57 : vector<16x32xf32>
    %cst_44 = arith.constant 0.707106769 : f32
    %64 = vector.broadcast %cst_44 : f32 to vector<16x32xf32>
    %65 = arith.mulf %57, %64 : vector<16x32xf32>
    %66 = math.erf %65 : vector<16x32xf32>
    %cst_45 = arith.constant 1.000000e+00 : f32
    %67 = vector.broadcast %cst_45 : f32 to vector<16x32xf32>
    %68 = arith.addf %67, %66 : vector<16x32xf32>
    %69 = arith.mulf %63, %68 : vector<16x32xf32>
    %cst_46 = arith.constant dense<0.000000e+00> : vector<16xf32>
    %70 = vector.multi_reduction <add>, %69, %cst_46 [1] : vector<16x32xf32> to vector<16xf32>
    %71 = vector.shape_cast %70 : vector<16xf32> to vector<16x1xf32>
    %cst_47 = arith.constant 3.200000e+01 : f32
    %72 = vector.broadcast %cst_47 : f32 to vector<16x1xf32>
    %73 = arith.divf %71, %72 : vector<16x1xf32>
    %74 = vector.broadcast %73 : vector<16x1xf32> to vector<16x32xf32>
    %75 = arith.subf %69, %74 : vector<16x32xf32>
    %76 = arith.mulf %75, %75 : vector<16x32xf32>
    %cst_48 = arith.constant dense<0.000000e+00> : vector<16xf32>
    %77 = vector.multi_reduction <add>, %76, %cst_48 [1] : vector<16x32xf32> to vector<16xf32>
    %78 = vector.shape_cast %77 : vector<16xf32> to vector<16x1xf32>
    %cst_49 = arith.constant 3.200000e+01 : f32
    %79 = vector.broadcast %cst_49 : f32 to vector<16x1xf32>
    %80 = arith.divf %78, %79 : vector<16x1xf32>
    %cst_50 = arith.constant 9.99999974E-6 : f32
    %81 = vector.broadcast %cst_50 : f32 to vector<16x1xf32>
    %82 = arith.addf %80, %81 : vector<16x1xf32>
    %83 = math.rsqrt %82 : vector<16x1xf32>
    %84 = vector.broadcast %83 : vector<16x1xf32> to vector<16x32xf32>
    %85 = arith.mulf %75, %84 : vector<16x32xf32>
    %86 = vector.broadcast %59 : vector<1x32xf32> to vector<16x32xf32>
    %87 = arith.mulf %85, %86 : vector<16x32xf32>
    %88 = vector.broadcast %61 : vector<1x32xf32> to vector<16x32xf32>
    %89 = arith.addf %87, %88 : vector<16x32xf32>
    %90 = arith.truncf %89 : vector<16x32xf32> to vector<16x32xbf16>
    %c1_51 = arith.constant 1 : index
    %c0_52 = arith.constant 0 : index
    %c0_53 = arith.constant 0 : index
    %91 = vector.load %arg6[%c1_51, %c0_52, %c0_53] : memref<3x32x128xbf16, #tpu.memory_space<vmem>>, vector<1x32x128xbf16>
    %92 = vector.shape_cast %91 : vector<1x32x128xbf16> to vector<32x128xbf16>
    %cst_54 = arith.constant dense<0.000000e+00> : vector<16x128xf32>
    %93 = tpu.matmul %90, %92, %cst_54 {dimension_numbers = #tpu.dot_dimension_numbers<[1], [0], [0], [1], [0, 0, 1, 1], [], []>} : vector<16x32xbf16>, vector<32x128xbf16>, vector<16x128xf32> -> vector<16x128xf32>
    %c1_55 = arith.constant 1 : index
    %c0_56 = arith.constant 0 : index
    %c0_57 = arith.constant 0 : index
    %94 = vector.load %arg7[%c1_55, %c0_56, %c0_57] : memref<3x1x128xf32, #tpu.memory_space<vmem>>, vector<1x1x128xf32>
    %95 = vector.shape_cast %94 : vector<1x1x128xf32> to vector<1x128xf32>
    %96 = vector.broadcast %95 : vector<1x128xf32> to vector<16x128xf32>
    %97 = arith.addf %93, %96 : vector<16x128xf32>
    %c1_58 = arith.constant 1 : index
    %c0_59 = arith.constant 0 : index
    %c0_60 = arith.constant 0 : index
    %98 = vector.load %arg8[%c1_58, %c0_59, %c0_60] : memref<3x16x128xf32, #tpu.memory_space<vmem>>, vector<1x16x128xf32>
    %99 = vector.shape_cast %98 : vector<1x16x128xf32> to vector<16x128xf32>
    %100 = vector.shape_cast %97 : vector<16x128xf32> to vector<1x16x128xf32>
    tpu.vector_store %arg8[%c1_58, %c0_59, %c0_60], %100 {strides = array<i32>} : memref<3x16x128xf32, #tpu.memory_space<vmem>>, vector<1x16x128xf32>,
    %c2 = arith.constant 2 : index
    %c0_61 = arith.constant 0 : index
    %c0_62 = arith.constant 0 : index
    %101 = vector.load %arg2[%c2, %c0_61, %c0_62] : memref<3x32x32xbf16, #tpu.memory_space<vmem>>, vector<1x32x32xbf16>
    %102 = vector.shape_cast %101 : vector<1x32x32xbf16> to vector<32x32xbf16>
    %cst_63 = arith.constant dense<0.000000e+00> : vector<16x32xf32>
    %103 = tpu.matmul %0, %102, %cst_63 {dimension_numbers = #tpu.dot_dimension_numbers<[1], [0], [0], [1], [0, 0, 1, 1], [], []>} : vector<16x32xbf16>, vector<32x32xbf16>, vector<16x32xf32> -> vector<16x32xf32>
    %c2_64 = arith.constant 2 : index
    %c0_65 = arith.constant 0 : index
    %c0_66 = arith.constant 0 : index
    %104 = vector.load %arg3[%c2_64, %c0_65, %c0_66] : memref<3x1x32xf32, #tpu.memory_space<vmem>>, vector<1x1x32xf32>
    %105 = vector.shape_cast %104 : vector<1x1x32xf32> to vector<1x32xf32>
    %106 = vector.broadcast %105 : vector<1x32xf32> to vector<16x32xf32>
    %107 = arith.addf %103, %106 : vector<16x32xf32>
    %c2_67 = arith.constant 2 : index
    %c0_68 = arith.constant 0 : index
    %c0_69 = arith.constant 0 : index
    %108 = vector.load %arg4[%c2_67, %c0_68, %c0_69] : memref<3x1x32xf32, #tpu.memory_space<vmem>>, vector<1x1x32xf32>
    %109 = vector.shape_cast %108 : vector<1x1x32xf32> to vector<1x32xf32>
    %c2_70 = arith.constant 2 : index
    %c0_71 = arith.constant 0 : index
    %c0_72 = arith.constant 0 : index
    %110 = vector.load %arg5[%c2_70, %c0_71, %c0_72] : memref<3x1x32xf32, #tpu.memory_space<vmem>>, vector<1x1x32xf32>
    %111 = vector.shape_cast %110 : vector<1x1x32xf32> to vector<1x32xf32>
    %cst_73 = arith.constant 5.000000e-01 : f32
    %112 = vector.broadcast %cst_73 : f32 to vector<16x32xf32>
    %113 = arith.mulf %112, %107 : vector<16x32xf32>
    %cst_74 = arith.constant 0.707106769 : f32
    %114 = vector.broadcast %cst_74 : f32 to vector<16x32xf32>
    %115 = arith.mulf %107, %114 : vector<16x32xf32>
    %116 = math.erf %115 : vector<16x32xf32>
    %cst_75 = arith.constant 1.000000e+00 : f32
    %117 = vector.broadcast %cst_75 : f32 to vector<16x32xf32>
    %118 = arith.addf %117, %116 : vector<16x32xf32>
    %119 = arith.mulf %113, %118 : vector<16x32xf32>
    %cst_76 = arith.constant dense<0.000000e+00> : vector<16xf32>
    %120 = vector.multi_reduction <add>, %119, %cst_76 [1] : vector<16x32xf32> to vector<16xf32>
    %121 = vector.shape_cast %120 : vector<16xf32> to vector<16x1xf32>
    %cst_77 = arith.constant 3.200000e+01 : f32
    %122 = vector.broadcast %cst_77 : f32 to vector<16x1xf32>
    %123 = arith.divf %121, %122 : vector<16x1xf32>
    %124 = vector.broadcast %123 : vector<16x1xf32> to vector<16x32xf32>
    %125 = arith.subf %119, %124 : vector<16x32xf32>
    %126 = arith.mulf %125, %125 : vector<16x32xf32>
    %cst_78 = arith.constant dense<0.000000e+00> : vector<16xf32>
    %127 = vector.multi_reduction <add>, %126, %cst_78 [1] : vector<16x32xf32> to vector<16xf32>
    %128 = vector.shape_cast %127 : vector<16xf32> to vector<16x1xf32>
    %cst_79 = arith.constant 3.200000e+01 : f32
    %129 = vector.broadcast %cst_79 : f32 to vector<16x1xf32>
    %130 = arith.divf %128, %129 : vector<16x1xf32>
    %cst_80 = arith.constant 9.99999974E-6 : f32
    %131 = vector.broadcast %cst_80 : f32 to vector<16x1xf32>
    %132 = arith.addf %130, %131 : vector<16x1xf32>
    %133 = math.rsqrt %132 : vector<16x1xf32>
    %134 = vector.broadcast %133 : vector<16x1xf32> to vector<16x32xf32>
    %135 = arith.mulf %125, %134 : vector<16x32xf32>
    %136 = vector.broadcast %109 : vector<1x32xf32> to vector<16x32xf32>
    %137 = arith.mulf %135, %136 : vector<16x32xf32>
    %138 = vector.broadcast %111 : vector<1x32xf32> to vector<16x32xf32>
    %139 = arith.addf %137, %138 : vector<16x32xf32>
    %140 = arith.truncf %139 : vector<16x32xf32> to vector<16x32xbf16>
    %c2_81 = arith.constant 2 : index
    %c0_82 = arith.constant 0 : index
    %c0_83 = arith.constant 0 : index
    %141 = vector.load %arg6[%c2_81, %c0_82, %c0_83] : memref<3x32x128xbf16, #tpu.memory_space<vmem>>, vector<1x32x128xbf16>
    %142 = vector.shape_cast %141 : vector<1x32x128xbf16> to vector<32x128xbf16>
    %cst_84 = arith.constant dense<0.000000e+00> : vector<16x128xf32>
    %143 = tpu.matmul %140, %142, %cst_84 {dimension_numbers = #tpu.dot_dimension_numbers<[1], [0], [0], [1], [0, 0, 1, 1], [], []>} : vector<16x32xbf16>, vector<32x128xbf16>, vector<16x128xf32> -> vector<16x128xf32>
    %c2_85 = arith.constant 2 : index
    %c0_86 = arith.constant 0 : index
    %c0_87 = arith.constant 0 : index
    %144 = vector.load %arg7[%c2_85, %c0_86, %c0_87] : memref<3x1x128xf32, #tpu.memory_space<vmem>>, vector<1x1x128xf32>
    %145 = vector.shape_cast %144 : vector<1x1x128xf32> to vector<1x128xf32>
    %146 = vector.broadcast %145 : vector<1x128xf32> to vector<16x128xf32>
    %147 = arith.addf %143, %146 : vector<16x128xf32>
    %c2_88 = arith.constant 2 : index
    %c0_89 = arith.constant 0 : index
    %c0_90 = arith.constant 0 : index
    %148 = vector.load %arg8[%c2_88, %c0_89, %c0_90] : memref<3x16x128xf32, #tpu.memory_space<vmem>>, vector<1x16x128xf32>
    %149 = vector.shape_cast %148 : vector<1x16x128xf32> to vector<16x128xf32>
    %150 = vector.shape_cast %147 : vector<16x128xf32> to vector<1x16x128xf32>
    tpu.vector_store %arg8[%c2_88, %c0_89, %c0_90], %150 {strides = array<i32>} : memref<3x16x128xf32, #tpu.memory_space<vmem>>, vector<1x16x128xf32>,
    return
  }
  func.func @transform_0(%arg0: i32) -> (i32, i32) {
    %c0_i32 = arith.constant 0 : i32
    %c0_i32_0 = arith.constant 0 : i32
    return %arg0, %c0_i32 : i32, i32
  }
  func.func @transform_1(%arg0: i32) -> (i32, i32, i32) {
    %c0_i32 = arith.constant 0 : i32
    %c0_i32_0 = arith.constant 0 : i32
    %c0_i32_1 = arith.constant 0 : i32
    %c0_i32_2 = arith.constant 0 : i32
    return %c0_i32, %c0_i32_0, %c0_i32_1 : i32, i32, i32
  }
  func.func @transform_2(%arg0: i32) -> (i32, i32, i32) {
    %c0_i32 = arith.constant 0 : i32
    %c0_i32_0 = arith.constant 0 : i32
    %c0_i32_1 = arith.constant 0 : i32
    %c0_i32_2 = arith.constant 0 : i32
    return %c0_i32, %c0_i32_0, %c0_i32_1 : i32, i32, i32
  }
  func.func @transform_3(%arg0: i32) -> (i32, i32, i32) {
    %c0_i32 = arith.constant 0 : i32
    %c0_i32_0 = arith.constant 0 : i32
    %c0_i32_1 = arith.constant 0 : i32
    %c0_i32_2 = arith.constant 0 : i32
    return %c0_i32, %c0_i32_0, %c0_i32_1 : i32, i32, i32
  }
  func.func @transform_4(%arg0: i32) -> (i32, i32, i32) {
    %c0_i32 = arith.constant 0 : i32
    %c0_i32_0 = arith.constant 0 : i32
    %c0_i32_1 = arith.constant 0 : i32
    %c0_i32_2 = arith.constant 0 : i32
    return %c0_i32, %c0_i32_0, %c0_i32_1 : i32, i32, i32
  }
  func.func @transform_5(%arg0: i32) -> (i32, i32, i32) {
    %c0_i32 = arith.constant 0 : i32
    %c0_i32_0 = arith.constant 0 : i32
    %c0_i32_1 = arith.constant 0 : i32
    %c0_i32_2 = arith.constant 0 : i32
    return %c0_i32, %c0_i32_0, %c0_i32_1 : i32, i32, i32
  }
  func.func @transform_6(%arg0: i32) -> (i32, i32, i32) {
    %c0_i32 = arith.constant 0 : i32
    %c0_i32_0 = arith.constant 0 : i32
    %c0_i32_1 = arith.constant 0 : i32
    %c0_i32_2 = arith.constant 0 : i32
    return %c0_i32, %c0_i32_0, %c0_i32_1 : i32, i32, i32
  }
  func.func @transform_7(%arg0: i32) -> (i32, i32, i32) {
    %c0_i32 = arith.constant 0 : i32
    %c0_i32_0 = arith.constant 0 : i32
    %c0_i32_1 = arith.constant 0 : i32
    return %c0_i32, %arg0, %c0_i32_0 : i32, i32, i32
  }
}

module attributes {stable_mosaic.version = 11 : i64} {
  func.func @_small_heads_kernel(%arg0: i32, %arg1: memref<16x32xbf16, #tpu.memory_space<vmem>>, %arg2: memref<3x32x32xbf16, #tpu.memory_space<vmem>>, %arg3: memref<3x1x32xf32, #tpu.memory_space<vmem>>, %arg4: memref<3x1x32xf32, #tpu.memory_space<vmem>>, %arg5: memref<3x1x32xf32, #tpu.memory_space<vmem>>, %arg6: memref<3x32x128xbf16, #tpu.memory_space<vmem>>, %arg7: memref<3x1x128xf32, #tpu.memory_space<vmem>>, %arg8: memref<3x16x128xf32, #tpu.memory_space<vmem>>) attributes {dimension_semantics = [#tpu.dimension_semantics<parallel>], iteration_bounds = array<i64: 1>, scalar_prefetch = 0 : i64, scratch_operands = 0 : i64, tpu.core_type = #tpu.core_type<tc>, window_params = [{transform_indices = @transform_0, window_bounds = array<i64: 16, 32>}, {pipeline_mode = #tpu.pipeline_mode<synchronous>, transform_indices = @transform_1, window_bounds = array<i64: 3, 32, 32>}, {pipeline_mode = #tpu.pipeline_mode<synchronous>, transform_indices = @transform_2, window_bounds = array<i64: 3, 1, 32>}, {pipeline_mode = #tpu.pipeline_mode<synchronous>, transform_indices = @transform_3, window_bounds = array<i64: 3, 1, 32>}, {pipeline_mode = #tpu.pipeline_mode<synchronous>, transform_indices = @transform_4, window_bounds = array<i64: 3, 1, 32>}, {pipeline_mode = #tpu.pipeline_mode<synchronous>, transform_indices = @transform_5, window_bounds = array<i64: 3, 32, 128>}, {pipeline_mode = #tpu.pipeline_mode<synchronous>, transform_indices = @transform_6, window_bounds = array<i64: 3, 1, 128>}, {transform_indices = @transform_7, window_bounds = array<i64: 3, 16, 128>}]} {
    %c0 = arith.constant 0 : index
    %c0_0 = arith.constant 0 : index
    %0 = vector.load %arg1[%c0, %c0_0] : memref<16x32xbf16, #tpu.memory_space<vmem>>, vector<16x32xbf16>
    %c0_1 = arith.constant 0 : index
    %c0_2 = arith.constant 0 : index
    %c0_3 = arith.constant 0 : index
    %1 = vector.load %arg2[%c0_1, %c0_2, %c0_3] : memref<3x32x32xbf16, #tpu.memory_space<vmem>>, vector<1x32x32xbf16>
    %2 = vector.shape_cast %1 : vector<1x32x32xbf16> to vector<32x32xbf16>
    %cst = arith.constant dense<0.000000e+00> : vector<16x32xf32>
    %3 = tpu.matmul %0, %2, %cst {dimension_numbers = #tpu.dot_dimension_numbers<[1], [0], [0], [1], [0, 0, 1, 1], [], []>} : vector<16x32xbf16>, vector<32x32xbf16>, vector<16x32xf32> -> vector<16x32xf32>
    %c0_4 = arith.constant 0 : index
    %c0_5 = arith.constant 0 : index
    %c0_6 = arith.constant 0 : index
    %4 = vector.load %arg3[%c0_4, %c0_5, %c0_6] : memref<3x1x32xf32, #tpu.memory_space<vmem>>, vector<1x1x32xf32>
    %5 = vector.shape_cast %4 : vector<1x1x32xf32> to vector<1x32xf32>
    %6 = vector.broadcast %5 : vector<1x32xf32> to vector<16x32xf32>
    %7 = arith.addf %3, %6 : vector<16x32xf32>
    %c0_7 = arith.constant 0 : index
    %c0_8 = arith.constant 0 : index
    %c0_9 = arith.constant 0 : index
    %8 = vector.load %arg4[%c0_7, %c0_8, %c0_9] : memref<3x1x32xf32, #tpu.memory_space<vmem>>, vector<1x1x32xf32>
    %9 = vector.shape_cast %8 : vector<1x1x32xf32> to vector<1x32xf32>
    %c0_10 = arith.constant 0 : index
    %c0_11 = arith.constant 0 : index
    %c0_12 = arith.constant 0 : index
    %10 = vector.load %arg5[%c0_10, %c0_11, %c0_12] : memref<3x1x32xf32, #tpu.memory_space<vmem>>, vector<1x1x32xf32>
    %11 = vector.shape_cast %10 : vector<1x1x32xf32> to vector<1x32xf32>
    %cst_13 = arith.constant 5.000000e-01 : f32
    %12 = vector.broadcast %cst_13 : f32 to vector<16x32xf32>
    %13 = arith.mulf %12, %7 : vector<16x32xf32>
    %cst_14 = arith.constant 0.707106769 : f32
    %14 = vector.broadcast %cst_14 : f32 to vector<16x32xf32>
    %15 = arith.mulf %7, %14 : vector<16x32xf32>
    %16 = math.erf %15 : vector<16x32xf32>
    %cst_15 = arith.constant 1.000000e+00 : f32
    %17 = vector.broadcast %cst_15 : f32 to vector<16x32xf32>
    %18 = arith.addf %17, %16 : vector<16x32xf32>
    %19 = arith.mulf %13, %18 : vector<16x32xf32>
    %cst_16 = arith.constant dense<0.000000e+00> : vector<16xf32>
    %20 = vector.multi_reduction <add>, %19, %cst_16 [1] : vector<16x32xf32> to vector<16xf32>
    %21 = vector.shape_cast %20 : vector<16xf32> to vector<16x1xf32>
    %cst_17 = arith.constant 3.200000e+01 : f32
    %22 = vector.broadcast %cst_17 : f32 to vector<16x1xf32>
    %23 = arith.divf %21, %22 : vector<16x1xf32>
    %24 = vector.broadcast %23 : vector<16x1xf32> to vector<16x32xf32>
    %25 = arith.subf %19, %24 : vector<16x32xf32>
    %26 = arith.mulf %25, %25 : vector<16x32xf32>
    %cst_18 = arith.constant dense<0.000000e+00> : vector<16xf32>
    %27 = vector.multi_reduction <add>, %26, %cst_18 [1] : vector<16x32xf32> to vector<16xf32>
    %28 = vector.shape_cast %27 : vector<16xf32> to vector<16x1xf32>
    %cst_19 = arith.constant 3.200000e+01 : f32
    %29 = vector.broadcast %cst_19 : f32 to vector<16x1xf32>
    %30 = arith.divf %28, %29 : vector<16x1xf32>
    %cst_20 = arith.constant 9.99999974E-6 : f32
    %31 = vector.broadcast %cst_20 : f32 to vector<16x1xf32>
    %32 = arith.addf %30, %31 : vector<16x1xf32>
    %33 = math.rsqrt %32 : vector<16x1xf32>
    %34 = vector.broadcast %33 : vector<16x1xf32> to vector<16x32xf32>
    %35 = arith.mulf %25, %34 : vector<16x32xf32>
    %36 = vector.broadcast %9 : vector<1x32xf32> to vector<16x32xf32>
    %37 = arith.mulf %35, %36 : vector<16x32xf32>
    %38 = vector.broadcast %11 : vector<1x32xf32> to vector<16x32xf32>
    %39 = arith.addf %37, %38 : vector<16x32xf32>
    %40 = arith.truncf %39 : vector<16x32xf32> to vector<16x32xbf16>
    %c0_21 = arith.constant 0 : index
    %c0_22 = arith.constant 0 : index
    %c0_23 = arith.constant 0 : index
    %41 = vector.load %arg6[%c0_21, %c0_22, %c0_23] : memref<3x32x128xbf16, #tpu.memory_space<vmem>>, vector<1x32x128xbf16>
    %42 = vector.shape_cast %41 : vector<1x32x128xbf16> to vector<32x128xbf16>
    %cst_24 = arith.constant dense<0.000000e+00> : vector<16x128xf32>
    %43 = tpu.matmul %40, %42, %cst_24 {dimension_numbers = #tpu.dot_dimension_numbers<[1], [0], [0], [1], [0, 0, 1, 1], [], []>} : vector<16x32xbf16>, vector<32x128xbf16>, vector<16x128xf32> -> vector<16x128xf32>
    %c0_25 = arith.constant 0 : index
    %c0_26 = arith.constant 0 : index
    %c0_27 = arith.constant 0 : index
    %44 = vector.load %arg7[%c0_25, %c0_26, %c0_27] : memref<3x1x128xf32, #tpu.memory_space<vmem>>, vector<1x1x128xf32>
    %45 = vector.shape_cast %44 : vector<1x1x128xf32> to vector<1x128xf32>
    %46 = vector.broadcast %45 : vector<1x128xf32> to vector<16x128xf32>
    %47 = arith.addf %43, %46 : vector<16x128xf32>
    %c0_28 = arith.constant 0 : index
    %c0_29 = arith.constant 0 : index
    %c0_30 = arith.constant 0 : index
    %48 = vector.load %arg8[%c0_28, %c0_29, %c0_30] : memref<3x16x128xf32, #tpu.memory_space<vmem>>, vector<1x16x128xf32>
    %49 = vector.shape_cast %48 : vector<1x16x128xf32> to vector<16x128xf32>
    %50 = vector.shape_cast %47 : vector<16x128xf32> to vector<1x16x128xf32>
    tpu.vector_store %arg8[%c0_28, %c0_29, %c0_30], %50 {strides = array<i32>} : memref<3x16x128xf32, #tpu.memory_space<vmem>>, vector<1x16x128xf32>,
    %c1 = arith.constant 1 : index
    %c0_31 = arith.constant 0 : index
    %c0_32 = arith.constant 0 : index
    %51 = vector.load %arg2[%c1, %c0_31, %c0_32] : memref<3x32x32xbf16, #tpu.memory_space<vmem>>, vector<1x32x32xbf16>
    %52 = vector.shape_cast %51 : vector<1x32x32xbf16> to vector<32x32xbf16>
    %cst_33 = arith.constant dense<0.000000e+00> : vector<16x32xf32>
    %53 = tpu.matmul %0, %52, %cst_33 {dimension_numbers = #tpu.dot_dimension_numbers<[1], [0], [0], [1], [0, 0, 1, 1], [], []>} : vector<16x32xbf16>, vector<32x32xbf16>, vector<16x32xf32> -> vector<16x32xf32>
    %c1_34 = arith.constant 1 : index
    %c0_35 = arith.constant 0 : index
    %c0_36 = arith.constant 0 : index
    %54 = vector.load %arg3[%c1_34, %c0_35, %c0_36] : memref<3x1x32xf32, #tpu.memory_space<vmem>>, vector<1x1x32xf32>
    %55 = vector.shape_cast %54 : vector<1x1x32xf32> to vector<1x32xf32>
    %56 = vector.broadcast %55 : vector<1x32xf32> to vector<16x32xf32>
    %57 = arith.addf %53, %56 : vector<16x32xf32>
    %c1_37 = arith.constant 1 : index
    %c0_38 = arith.constant 0 : index
    %c0_39 = arith.constant 0 : index
    %58 = vector.load %arg4[%c1_37, %c0_38, %c0_39] : memref<3x1x32xf32, #tpu.memory_space<vmem>>, vector<1x1x32xf32>
    %59 = vector.shape_cast %58 : vector<1x1x32xf32> to vector<1x32xf32>
    %c1_40 = arith.constant 1 : index
    %c0_41 = arith.constant 0 : index
    %c0_42 = arith.constant 0 : index
    %60 = vector.load %arg5[%c1_40, %c0_41, %c0_42] : memref<3x1x32xf32, #tpu.memory_space<vmem>>, vector<1x1x32xf32>
    %61 = vector.shape_cast %60 : vector<1x1x32xf32> to vector<1x32xf32>
    %cst_43 = arith.constant 5.000000e-01 : f32
    %62 = vector.broadcast %cst_43 : f32 to vector<16x32xf32>
    %63 = arith.mulf %62, %57 : vector<16x32xf32>
    %cst_44 = arith.constant 0.707106769 : f32
    %64 = vector.broadcast %cst_44 : f32 to vector<16x32xf32>
    %65 = arith.mulf %57, %64 : vector<16x32xf32>
    %66 = math.erf %65 : vector<16x32xf32>
    %cst_45 = arith.constant 1.000000e+00 : f32
    %67 = vector.broadcast %cst_45 : f32 to vector<16x32xf32>
    %68 = arith.addf %67, %66 : vector<16x32xf32>
    %69 = arith.mulf %63, %68 : vector<16x32xf32>
    %cst_46 = arith.constant dense<0.000000e+00> : vector<16xf32>
    %70 = vector.multi_reduction <add>, %69, %cst_46 [1] : vector<16x32xf32> to vector<16xf32>
    %71 = vector.shape_cast %70 : vector<16xf32> to vector<16x1xf32>
    %cst_47 = arith.constant 3.200000e+01 : f32
    %72 = vector.broadcast %cst_47 : f32 to vector<16x1xf32>
    %73 = arith.divf %71, %72 : vector<16x1xf32>
    %74 = vector.broadcast %73 : vector<16x1xf32> to vector<16x32xf32>
    %75 = arith.subf %69, %74 : vector<16x32xf32>
    %76 = arith.mulf %75, %75 : vector<16x32xf32>
    %cst_48 = arith.constant dense<0.000000e+00> : vector<16xf32>
    %77 = vector.multi_reduction <add>, %76, %cst_48 [1] : vector<16x32xf32> to vector<16xf32>
    %78 = vector.shape_cast %77 : vector<16xf32> to vector<16x1xf32>
    %cst_49 = arith.constant 3.200000e+01 : f32
    %79 = vector.broadcast %cst_49 : f32 to vector<16x1xf32>
    %80 = arith.divf %78, %79 : vector<16x1xf32>
    %cst_50 = arith.constant 9.99999974E-6 : f32
    %81 = vector.broadcast %cst_50 : f32 to vector<16x1xf32>
    %82 = arith.addf %80, %81 : vector<16x1xf32>
    %83 = math.rsqrt %82 : vector<16x1xf32>
    %84 = vector.broadcast %83 : vector<16x1xf32> to vector<16x32xf32>
    %85 = arith.mulf %75, %84 : vector<16x32xf32>
    %86 = vector.broadcast %59 : vector<1x32xf32> to vector<16x32xf32>
    %87 = arith.mulf %85, %86 : vector<16x32xf32>
    %88 = vector.broadcast %61 : vector<1x32xf32> to vector<16x32xf32>
    %89 = arith.addf %87, %88 : vector<16x32xf32>
    %90 = arith.truncf %89 : vector<16x32xf32> to vector<16x32xbf16>
    %c1_51 = arith.constant 1 : index
    %c0_52 = arith.constant 0 : index
    %c0_53 = arith.constant 0 : index
    %91 = vector.load %arg6[%c1_51, %c0_52, %c0_53] : memref<3x32x128xbf16, #tpu.memory_space<vmem>>, vector<1x32x128xbf16>
    %92 = vector.shape_cast %91 : vector<1x32x128xbf16> to vector<32x128xbf16>
    %cst_54 = arith.constant dense<0.000000e+00> : vector<16x128xf32>
    %93 = tpu.matmul %90, %92, %cst_54 {dimension_numbers = #tpu.dot_dimension_numbers<[1], [0], [0], [1], [0, 0, 1, 1], [], []>} : vector<16x32xbf16>, vector<32x128xbf16>, vector<16x128xf32> -> vector<16x128xf32>
    %c1_55 = arith.constant 1 : index
    %c0_56 = arith.constant 0 : index
    %c0_57 = arith.constant 0 : index
    %94 = vector.load %arg7[%c1_55, %c0_56, %c0_57] : memref<3x1x128xf32, #tpu.memory_space<vmem>>, vector<1x1x128xf32>
    %95 = vector.shape_cast %94 : vector<1x1x128xf32> to vector<1x128xf32>
    %96 = vector.broadcast %95 : vector<1x128xf32> to vector<16x128xf32>
    %97 = arith.addf %93, %96 : vector<16x128xf32>
    %c1_58 = arith.constant 1 : index
    %c0_59 = arith.constant 0 : index
    %c0_60 = arith.constant 0 : index
    %98 = vector.load %arg8[%c1_58, %c0_59, %c0_60] : memref<3x16x128xf32, #tpu.memory_space<vmem>>, vector<1x16x128xf32>
    %99 = vector.shape_cast %98 : vector<1x16x128xf32> to vector<16x128xf32>
    %100 = vector.shape_cast %97 : vector<16x128xf32> to vector<1x16x128xf32>
    tpu.vector_store %arg8[%c1_58, %c0_59, %c0_60], %100 {strides = array<i32>} : memref<3x16x128xf32, #tpu.memory_space<vmem>>, vector<1x16x128xf32>,
    %c2 = arith.constant 2 : index
    %c0_61 = arith.constant 0 : index
    %c0_62 = arith.constant 0 : index
    %101 = vector.load %arg2[%c2, %c0_61, %c0_62] : memref<3x32x32xbf16, #tpu.memory_space<vmem>>, vector<1x32x32xbf16>
    %102 = vector.shape_cast %101 : vector<1x32x32xbf16> to vector<32x32xbf16>
    %cst_63 = arith.constant dense<0.000000e+00> : vector<16x32xf32>
    %103 = tpu.matmul %0, %102, %cst_63 {dimension_numbers = #tpu.dot_dimension_numbers<[1], [0], [0], [1], [0, 0, 1, 1], [], []>} : vector<16x32xbf16>, vector<32x32xbf16>, vector<16x32xf32> -> vector<16x32xf32>
    %c2_64 = arith.constant 2 : index
    %c0_65 = arith.constant 0 : index
    %c0_66 = arith.constant 0 : index
    %104 = vector.load %arg3[%c2_64, %c0_65, %c0_66] : memref<3x1x32xf32, #tpu.memory_space<vmem>>, vector<1x1x32xf32>
    %105 = vector.shape_cast %104 : vector<1x1x32xf32> to vector<1x32xf32>
    %106 = vector.broadcast %105 : vector<1x32xf32> to vector<16x32xf32>
    %107 = arith.addf %103, %106 : vector<16x32xf32>
    %c2_67 = arith.constant 2 : index
    %c0_68 = arith.constant 0 : index
    %c0_69 = arith.constant 0 : index
    %108 = vector.load %arg4[%c2_67, %c0_68, %c0_69] : memref<3x1x32xf32, #tpu.memory_space<vmem>>, vector<1x1x32xf32>
    %109 = vector.shape_cast %108 : vector<1x1x32xf32> to vector<1x32xf32>
    %c2_70 = arith.constant 2 : index
    %c0_71 = arith.constant 0 : index
    %c0_72 = arith.constant 0 : index
    %110 = vector.load %arg5[%c2_70, %c0_71, %c0_72] : memref<3x1x32xf32, #tpu.memory_space<vmem>>, vector<1x1x32xf32>
    %111 = vector.shape_cast %110 : vector<1x1x32xf32> to vector<1x32xf32>
    %cst_73 = arith.constant 5.000000e-01 : f32
    %112 = vector.broadcast %cst_73 : f32 to vector<16x32xf32>
    %113 = arith.mulf %112, %107 : vector<16x32xf32>
    %cst_74 = arith.constant 0.707106769 : f32
    %114 = vector.broadcast %cst_74 : f32 to vector<16x32xf32>
    %115 = arith.mulf %107, %114 : vector<16x32xf32>
    %116 = math.erf %115 : vector<16x32xf32>
    %cst_75 = arith.constant 1.000000e+00 : f32
    %117 = vector.broadcast %cst_75 : f32 to vector<16x32xf32>
    %118 = arith.addf %117, %116 : vector<16x32xf32>
    %119 = arith.mulf %113, %118 : vector<16x32xf32>
    %cst_76 = arith.constant dense<0.000000e+00> : vector<16xf32>
    %120 = vector.multi_reduction <add>, %119, %cst_76 [1] : vector<16x32xf32> to vector<16xf32>
    %121 = vector.shape_cast %120 : vector<16xf32> to vector<16x1xf32>
    %cst_77 = arith.constant 3.200000e+01 : f32
    %122 = vector.broadcast %cst_77 : f32 to vector<16x1xf32>
    %123 = arith.divf %121, %122 : vector<16x1xf32>
    %124 = vector.broadcast %123 : vector<16x1xf32> to vector<16x32xf32>
    %125 = arith.subf %119, %124 : vector<16x32xf32>
    %126 = arith.mulf %125, %125 : vector<16x32xf32>
    %cst_78 = arith.constant dense<0.000000e+00> : vector<16xf32>
    %127 = vector.multi_reduction <add>, %126, %cst_78 [1] : vector<16x32xf32> to vector<16xf32>
    %128 = vector.shape_cast %127 : vector<16xf32> to vector<16x1xf32>
    %cst_79 = arith.constant 3.200000e+01 : f32
    %129 = vector.broadcast %cst_79 : f32 to vector<16x1xf32>
    %130 = arith.divf %128, %129 : vector<16x1xf32>
    %cst_80 = arith.constant 9.99999974E-6 : f32
    %131 = vector.broadcast %cst_80 : f32 to vector<16x1xf32>
    %132 = arith.addf %130, %131 : vector<16x1xf32>
    %133 = math.rsqrt %132 : vector<16x1xf32>
    %134 = vector.broadcast %133 : vector<16x1xf32> to vector<16x32xf32>
    %135 = arith.mulf %125, %134 : vector<16x32xf32>
    %136 = vector.broadcast %109 : vector<1x32xf32> to vector<16x32xf32>
    %137 = arith.mulf %135, %136 : vector<16x32xf32>
    %138 = vector.broadcast %111 : vector<1x32xf32> to vector<16x32xf32>
    %139 = arith.addf %137, %138 : vector<16x32xf32>
    %140 = arith.truncf %139 : vector<16x32xf32> to vector<16x32xbf16>
    %c2_81 = arith.constant 2 : index
    %c0_82 = arith.constant 0 : index
    %c0_83 = arith.constant 0 : index
    %141 = vector.load %arg6[%c2_81, %c0_82, %c0_83] : memref<3x32x128xbf16, #tpu.memory_space<vmem>>, vector<1x32x128xbf16>
    %142 = vector.shape_cast %141 : vector<1x32x128xbf16> to vector<32x128xbf16>
    %cst_84 = arith.constant dense<0.000000e+00> : vector<16x128xf32>
    %143 = tpu.matmul %140, %142, %cst_84 {dimension_numbers = #tpu.dot_dimension_numbers<[1], [0], [0], [1], [0, 0, 1, 1], [], []>} : vector<16x32xbf16>, vector<32x128xbf16>, vector<16x128xf32> -> vector<16x128xf32>
    %c2_85 = arith.constant 2 : index
    %c0_86 = arith.constant 0 : index
    %c0_87 = arith.constant 0 : index
    %144 = vector.load %arg7[%c2_85, %c0_86, %c0_87] : memref<3x1x128xf32, #tpu.memory_space<vmem>>, vector<1x1x128xf32>
    %145 = vector.shape_cast %144 : vector<1x1x128xf32> to vector<1x128xf32>
    %146 = vector.broadcast %145 : vector<1x128xf32> to vector<16x128xf32>
    %147 = arith.addf %143, %146 : vector<16x128xf32>
    %c2_88 = arith.constant 2 : index
    %c0_89 = arith.constant 0 : index
    %c0_90 = arith.constant 0 : index
    %148 = vector.load %arg8[%c2_88, %c0_89, %c0_90] : memref<3x16x128xf32, #tpu.memory_space<vmem>>, vector<1x16x128xf32>
    %149 = vector.shape_cast %148 : vector<1x16x128xf32> to vector<16x128xf32>
    %150 = vector.shape_cast %147 : vector<16x128xf32> to vector<1x16x128xf32>
    tpu.vector_store %arg8[%c2_88, %c0_89, %c0_90], %150 {strides = array<i32>} : memref<3x16x128xf32, #tpu.memory_space<vmem>>, vector<1x16x128xf32>,
    return
  }
  func.func @transform_0(%arg0: i32) -> (i32, i32) {
    %c0_i32 = arith.constant 0 : i32
    %c0_i32_0 = arith.constant 0 : i32
    return %arg0, %c0_i32 : i32, i32
  }
  func.func @transform_1(%arg0: i32) -> (i32, i32, i32) {
    %c0_i32 = arith.constant 0 : i32
    %c0_i32_0 = arith.constant 0 : i32
    %c0_i32_1 = arith.constant 0 : i32
    %c0_i32_2 = arith.constant 0 : i32
    return %c0_i32, %c0_i32_0, %c0_i32_1 : i32, i32, i32
  }
  func.func @transform_2(%arg0: i32) -> (i32, i32, i32) {
    %c0_i32 = arith.constant 0 : i32
    %c0_i32_0 = arith.constant 0 : i32
    %c0_i32_1 = arith.constant 0 : i32
    %c0_i32_2 = arith.constant 0 : i32
    return %c0_i32, %c0_i32_0, %c0_i32_1 : i32, i32, i32
  }
  func.func @transform_3(%arg0: i32) -> (i32, i32, i32) {
    %c0_i32 = arith.constant 0 : i32
    %c0_i32_0 = arith.constant 0 : i32
    %c0_i32_1 = arith.constant 0 : i32
    %c0_i32_2 = arith.constant 0 : i32
    return %c0_i32, %c0_i32_0, %c0_i32_1 : i32, i32, i32
  }
  func.func @transform_4(%arg0: i32) -> (i32, i32, i32) {
    %c0_i32 = arith.constant 0 : i32
    %c0_i32_0 = arith.constant 0 : i32
    %c0_i32_1 = arith.constant 0 : i32
    %c0_i32_2 = arith.constant 0 : i32
    return %c0_i32, %c0_i32_0, %c0_i32_1 : i32, i32, i32
  }
  func.func @transform_5(%arg0: i32) -> (i32, i32, i32) {
    %c0_i32 = arith.constant 0 : i32
    %c0_i32_0 = arith.constant 0 : i32
    %c0_i32_1 = arith.constant 0 : i32
    %c0_i32_2 = arith.constant 0 : i32
    return %c0_i32, %c0_i32_0, %c0_i32_1 : i32, i32, i32
  }
  func.func @transform_6(%arg0: i32) -> (i32, i32, i32) {
    %c0_i32 = arith.constant 0 : i32
    %c0_i32_0 = arith.constant 0 : i32
    %c0_i32_1 = arith.constant 0 : i32
    %c0_i32_2 = arith.constant 0 : i32
    return %c0_i32, %c0_i32_0, %c0_i32_1 : i32, i32, i32
  }
  func.func @transform_7(%arg0: i32) -> (i32, i32, i32) {
    %c0_i32 = arith.constant 0 : i32
    %c0_i32_0 = arith.constant 0 : i32
    %c0_i32_1 = arith.constant 0 : i32
    return %c0_i32, %arg0, %c0_i32_0 : i32, i32, i32
  }
}

</mosaic_0001>

<bundles_post_ra>
// kernel: tpu_custom_call.1
= control target key start
LH: loop header
LB: loop body
LE: loop exit
PB: predicated region body
PF: predicated region fallthrough
CT: control target
= control target key end

     0   :  { %12 = vsyncpa [#allocation3], 0  ;;  %s1304_s0 = inlined_call_operand.hbm [shape: bf16[16,32], index: 0, kind: input, shape index: {}]   ;;  %s1305_s1 = inlined_call_operand.hbm [shape: bf16[3,32,32], index: 1, kind: input, shape index: {}]   ;;  %s1306_s2 = inlined_call_operand.hbm [shape: f32[3,1,32], index: 2, kind: input, shape index: {}]   ;;  %s1307_s3 = inlined_call_operand.hbm [shape: f32[3,1,32], index: 3, kind: input, shape index: {}]   ;;  %s1308_s4 = inlined_call_operand.hbm [shape: f32[3,1,32], index: 4, kind: input, shape index: {}]   ;;  %s1309_s5 = inlined_call_operand.hbm [shape: bf16[3,32,128], index: 5, kind: input, shape index: {}]   ;;  %s1310_s6 = inlined_call_operand.hbm [shape: f32[3,1,128], index: 6, kind: input, shape index: {}]   ;;  %s1311_s7 = inlined_call_operand.hbm [shape: f32[3,16,128], index: 7, kind: output, shape index: {}]  }
   0x1   :  { %13 = vsyncpa [#allocation6], 0 }
   0x2   :  { %14 = vsyncpa [#allocation9], 0 }
   0x3   :  { %15 = vsyncpa [#allocation12], 0 }
   0x4   :  { %16 = vsyncpa [#allocation4], 0  ;;  %s1069_s24 = smov [#allocation5]   ;;  %s883_s28 = scalar_lea.hbm %s1305_s1, 768 }
   0x5   :  { %s34_s25 = sshll.u32 %s1069_s24, 4  ;;  %p884_p0 = scmp.ne.s32.totalorder %s1305_s1, %s883_s28  ;;  %s35_s25 = int_to_ptr.vmem [resolvable:$true] %s34_s25 }
   0x6   :  { %p887_p1 = scmp.lt.u32.totalorder %s883_s28, %s1305_s1 }
   0x8   :  { %p889_p2 = pnand %p887_p1, %p884_p0 }
   0xa   :  { %892 = shalt.err (!%p889_p2)
}
   0xb   :  { %s893_s10 = scalar_lea.vmem %s35_s25, 768  ;;  %p898_p4 = scmp.lt.s32.totalorder %s35_s25, %s35_s25 }
   0xc   :  { %p894_p3 = scmp.ne.s32.totalorder %s35_s25, %s893_s10  ;;  %p899_p5 = scmp.lt.s32.totalorder %s893_s10, %s893_s10 }
   0xe   :  { %p900_p6 = por %p899_p5, %p898_p4 }
  0x10   :  { %p901_p7 = pnand %p900_p6, %p894_p3 }
  0x12   :  { %904 = shalt.err (!%p901_p7)
}
  0x13   :  { %s1070_s11 = smov 64   ;;  %s1071_s12 = smov 4  }
  0x14   :  { %40 = dma.hbm_to_vmem [thread:$0]  %s1305_s1, 768, %s35_s25, [#allocation6], %s1070_s11, %s1070_s11, %s1071_s12  }
  0x15   :  { %s1072_s15 = smov [#allocation8]   ;;  %s1073_s17 = smov [#allocation11]  }
  0x16   :  { %s58_s16 = sshll.u32 %s1072_s15, 4  ;;  %s82_s18 = sshll.u32 %s1073_s17, 4  ;;  %s59_s16 = int_to_ptr.vmem [resolvable:$true] %s58_s16  ;;  %s83_s18 = int_to_ptr.vmem [resolvable:$true] %s82_s18 }
  0x17   :  { %s905_s21 = scalar_lea.hbm %s1307_s3, 48 }
  0x18   :  { %p906_p8 = scmp.ne.s32.totalorder %s1307_s3, %s905_s21  ;;  %p909_p9 = scmp.lt.u32.totalorder %s905_s21, %s1307_s3 }
  0x1a   :  { %p911_p10 = pnand %p909_p9, %p906_p8 }
  0x1c   :  { %914 = shalt.err (!%p911_p10)
}
  0x1d   :  { %s915_s1 = scalar_lea.vmem %s59_s16, 48  ;;  %s919_s25 = scalar_lea.vmem %s59_s16, 64 }
  0x1e   :  { %p916_p11 = scmp.ne.s32.totalorder %s59_s16, %s915_s1  ;;  %p920_p12 = scmp.lt.s32.totalorder %s59_s16, %s59_s16 }
  0x1f   :  { %p921_p13 = scmp.lt.s32.totalorder %s919_s25, %s915_s1 }
  0x21   :  { %p922_p0 = por %p921_p13, %p920_p12 }
  0x23   :  { %p923_p1 = pnand %p922_p0, %p916_p11 }
  0x25   :  { %926 = shalt.err (!%p923_p1)
}
  0x26   :  { %s1074_s27 = smov 16   ;;  %s1075_s28 = smov 1  }
  0x27   :  { %64 = dma.hbm_to_vmem [thread:$0]  %s1307_s3, 48, %s59_s16, [#allocation9], %s1074_s27, %s1074_s27, %s1075_s28  }
  0x28   :  { %s927_s10 = scalar_lea.hbm %s1309_s5, 768 }
  0x29   :  { %p928_p2 = scmp.ne.s32.totalorder %s1309_s5, %s927_s10  ;;  %p931_p3 = scmp.lt.u32.totalorder %s927_s10, %s1309_s5 }
  0x2b   :  { %p933_p4 = pnand %p931_p3, %p928_p2 }
  0x2d   :  { %936 = shalt.err (!%p933_p4)
}
  0x2e   :  { %s937_s19 = scalar_lea.vmem %s83_s18, 768  ;;  %p942_p6 = scmp.lt.s32.totalorder %s83_s18, %s83_s18 }
  0x2f   :  { %p938_p5 = scmp.ne.s32.totalorder %s83_s18, %s937_s19  ;;  %p943_p7 = scmp.lt.s32.totalorder %s937_s19, %s937_s19 }
  0x31   :  { %p944_p8 = por %p943_p7, %p942_p6 }
  0x33   :  { %p945_p9 = pnand %p944_p8, %p938_p5 }
  0x35   :  { %948 = shalt.err (!%p945_p9)
}
  0x36   :  { %88 = dma.hbm_to_vmem [thread:$0]  %s1309_s5, 768, %s83_s18, [#allocation12], %s1070_s11, %s1070_s11, %s1071_s12  }
  0x37   :  { %s1076_s20 = smov [#allocation2]   ;;  %s1077_s22 = smov [#allocation7]  }
  0x38   :  { %s22_s21 = sshll.u32 %s1076_s20, 4  ;;  %s46_s23 = sshll.u32 %s1077_s22, 4  ;;  %s23_s21 = int_to_ptr.vmem [resolvable:$true] %s22_s21  ;;  %s47_s23 = int_to_ptr.vmem [resolvable:$true] %s46_s23 }
  0x39   :  { %s949_s1 = scalar_lea.hbm %s1304_s0, 128 }
  0x3a   :  { %p950_p10 = scmp.ne.s32.totalorder %s1304_s0, %s949_s1  ;;  %p953_p11 = scmp.lt.u32.totalorder %s949_s1, %s1304_s0 }
  0x3c   :  { %p955_p12 = pnand %p953_p11, %p950_p10 }
  0x3e   :  { %958 = shalt.err (!%p955_p12)
}
  0x3f   :  { %s959_s5 = scalar_lea.vmem %s23_s21, 128  ;;  %p964_p0 = scmp.lt.s32.totalorder %s23_s21, %s23_s21 }
  0x40   :  { %p960_p13 = scmp.ne.s32.totalorder %s23_s21, %s959_s5  ;;  %p965_p1 = scmp.lt.s32.totalorder %s959_s5, %s959_s5 }
  0x42   :  { %p966_p2 = por %p965_p1, %p964_p0 }
  0x44   :  { %p967_p3 = pnand %p966_p2, %p960_p13 }
  0x46   :  { %970 = shalt.err (!%p967_p3)
}
  0x47   :  { %28 = dma.hbm_to_vmem [thread:$0]  %s1304_s0, 128, %s23_s21, [#allocation3], %s1070_s11, %s1070_s11, %s1071_s12  }
  0x48   :  { %s971_s14 = scalar_lea.hbm %s1306_s2, 48 }
  0x49   :  { %p972_p4 = scmp.ne.s32.totalorder %s1306_s2, %s971_s14  ;;  %p975_p5 = scmp.lt.u32.totalorder %s971_s14, %s1306_s2 }
  0x4b   :  { %p977_p6 = pnand %p975_p5, %p972_p4 }
  0x4d   :  { %980 = shalt.err (!%p977_p6)
}
  0x4e   :  { %s981_s16 = scalar_lea.vmem %s47_s23, 48  ;;  %s985_s20 = scalar_lea.vmem %s47_s23, 64 }
  0x4f   :  { %p982_p7 = scmp.ne.s32.totalorder %s47_s23, %s981_s16  ;;  %p986_p8 = scmp.lt.s32.totalorder %s47_s23, %s47_s23 }
  0x50   :  { %p987_p9 = scmp.lt.s32.totalorder %s985_s20, %s981_s16 }
  0x52   :  { %p988_p10 = por %p987_p9, %p986_p8 }
  0x54   :  { %p989_p11 = pnand %p988_p10, %p982_p7 }
  0x56   :  { %992 = shalt.err (!%p989_p11)
}
  0x57   :  { %52 = dma.hbm_to_vmem [thread:$0]  %s1306_s2, 48, %s47_s23, [#allocation6], %s1074_s27, %s1074_s27, %s1075_s28  }
  0x58   :  { %s1078_s12 = smov [#allocation10]   ;;  %s1079_s22 = smov [#allocation13]  }
  0x59   :  { %s70_s21 = sshll.u32 %s1078_s12, 4  ;;  %s94_s24 = sshll.u32 %s1079_s22, 4  ;;  %s71_s21 = int_to_ptr.vmem [resolvable:$true] %s70_s21  ;;  %s95_s24 = int_to_ptr.vmem [resolvable:$true] %s94_s24 }
  0x5a   :  { %s993_s25 = scalar_lea.hbm %s1308_s4, 48 }
  0x5b   :  { %p994_p12 = scmp.ne.s32.totalorder %s1308_s4, %s993_s25  ;;  %p997_p13 = scmp.lt.u32.totalorder %s993_s25, %s1308_s4 }
  0x5d   :  { %p999_p0 = pnand %p997_p13, %p994_p12 }
  0x5f   :  { %1002 = shalt.err (!%p999_p0)
}
  0x60   :  { %s1003_s2 = scalar_lea.vmem %s71_s21, 48  ;;  %s1007_s23 = scalar_lea.vmem %s71_s21, 64 }
  0x61   :  { %p1004_p1 = scmp.ne.s32.totalorder %s71_s21, %s1003_s2  ;;  %p1008_p2 = scmp.lt.s32.totalorder %s71_s21, %s71_s21 }
  0x62   :  { %p1009_p3 = scmp.lt.s32.totalorder %s1007_s23, %s1003_s2 }
  0x64   :  { %p1010_p4 = por %p1009_p3, %p1008_p2 }
  0x66   :  { %p1011_p5 = pnand %p1010_p4, %p1004_p1 }
  0x68   :  { %1014 = shalt.err (!%p1011_p5)
}
  0x69   :  { %76 = dma.hbm_to_vmem [thread:$0]  %s1308_s4, 48, %s71_s21, [#allocation9], %s1074_s27, %s1074_s27, %s1075_s28  }
  0x6a   :  { %s1015_s14 = scalar_lea.hbm %s1310_s6, 48 }
  0x6b   :  { %p1016_p6 = scmp.ne.s32.totalorder %s1310_s6, %s1015_s14  ;;  %p1019_p7 = scmp.lt.u32.totalorder %s1015_s14, %s1310_s6 }
  0x6d   :  { %p1021_p8 = pnand %p1019_p7, %p1016_p6 }
  0x6f   :  { %1024 = shalt.err (!%p1021_p8)
}
  0x70   :  { %s1025_s16 = scalar_lea.vmem %s95_s24, 48  ;;  %s1029_s20 = scalar_lea.vmem %s95_s24, 64 }
  0x71   :  { %p1026_p9 = scmp.ne.s32.totalorder %s95_s24, %s1025_s16  ;;  %p1030_p10 = scmp.lt.s32.totalorder %s95_s24, %s95_s24 }
  0x72   :  { %p1031_p11 = scmp.lt.s32.totalorder %s1029_s20, %s1025_s16 }
  0x74   :  { %p1032_p12 = por %p1031_p11, %p1030_p10 }
  0x76   :  { %p1033_p13 = pnand %p1032_p12, %p1026_p9 }
  0x78   :  { %1036 = shalt.err (!%p1033_p13)
}
  0x79   :  { %100 = dma.hbm_to_vmem [thread:$0]  %s1310_s6, 48, %s95_s24, [#allocation12], %s1074_s27, %s1074_s27, %s1075_s28  }
  0x7a   :  { %1059 = dma.done.wait [#allocation3], 128  }
  0x7b   :  { %1060 = vsyncadd [#allocation3], 4294967168 }
  0x7c   :  { %1061 = dma.done.wait [#allocation6], 816  }
  0x7d   :  { %1062 = vsyncadd [#allocation6], 4294966480 }
  0x7e   :  { %1063 = dma.done.wait [#allocation9], 96  }
  0x7f   :  { %1064 = vsyncadd [#allocation9], 4294967200 }
  0x80   :  { %1065 = dma.done.wait [#allocation12], 816  }
  0x81   :  { %1066 = vsyncadd [#allocation12], 4294966480  ;;  %v1080_v0 = vmov 0.0   ;;  %vm1081_vm0 = vmmov 0   ;;  %v846_v1 = vld [vmem:[#allocation5] sm:$0xff]   ;;  %v847_v2 = vld [vmem:[#allocation5 + $0x8] sm:$0xff]  }
  0x82   :  { %782 = vmatprep.subr.bf16.mxu0 %v1080_v0  ;;  %786 = vmatprep.mubr.msk.bf16.mxu0 %vm1081_vm0, %v1080_v0  ;;  %v848_v3 = vld [vmem:[#allocation2] sm:$0xff]   ;;  %vm153_vm1 = vcmask 261120   ;;  %v849_v4 = vld [vmem:[#allocation5 + $0x10] sm:$0xff]   ;;  %v851_v6 = vld [vmem:[#allocation5 + $0x20] sm:$0xff]   ;;  %s1082_s6 = smov [#allocation14]  }
  0x83   :  { %790 = vmatprep.subr.bf16.mxu1 %v1080_v0  ;;  %794 = vmatprep.mubr.msk.bf16.mxu1 %vm1081_vm0, %v1080_v0  ;;  %v850_v5 = vld [vmem:[#allocation5 + $0x18] sm:$0xff]   ;;  %v852_v7 = vld [vmem:[#allocation5 + $0x28] sm:$0xff]   ;;  %v733_v8 = vld [vmem:[#allocation7] ss:$0 sm:$0xff]  ;;  %s718_s27 = sshll.u32 %s1082_s6, 4  ;;  %s719_s27 = int_to_ptr.vmem [resolvable:$true] %s718_s27 }
  0x84   :  { %783 = vmatpush3.bf16.msra.mxu0 %v846_v1  ;;  %v744_v17 = vld [vmem:[#allocation7 + $0x1] ss:$0 sm:$0xff]  ;;  %v754_v26 = vld [vmem:[#allocation7 + $0x2] ss:$0 sm:$0xff]  ;;  %s1037_s28 = scalar_lea.vmem %s719_s27, 768  ;;  %p1042_p1 = scmp.lt.s32.totalorder %s719_s27, %s719_s27 }
  0x85   :  { %784 = vmatprep.subr.bf16.mxu0 %v1080_v0  ;;  %p1038_p0 = scmp.ne.s32.totalorder %s719_s27, %s1037_s28  ;;  %p1043_p2 = scmp.lt.s32.totalorder %s1037_s28, %s1037_s28 }
  0x87   :  { %p1044_p3 = por %p1043_p2, %p1042_p1 }
  0x88   :  { %785 = vmatpush3.bf16.msra.mxu0 %v847_v2 }
  0x89   :  { %798 = vmatprep.subr.bf16.mxu0 %v1080_v0  ;;  %p1045_p4 = pnand %p1044_p3, %p1038_p0 }
  0x8b   :  { %787 = vmatmul.mubr.msk.bf16.vlgmr.msra.gmra.mrb[0].mxu0 %vm153_vm1, %v848_v3 }
  0x8c   :  { %799 = vmatpush3.bf16.msra.mxu0 %v849_v4  ;;  %802 = vmatprep.mubr.msk.bf16.mxu0 %vm1081_vm0, %v1080_v0 }
  0x8d   :  { %800 = vmatprep.subr.bf16.mxu0 %v1080_v0 }
  0x90   :  { %801 = vmatpush3.bf16.msra.mxu0 %v850_v5 }
  0x91   :  { %814 = vmatprep.subr.bf16.mxu0 %v1080_v0 }
  0x93   :  { %803 = vmatmul.mubr.msk.bf16.vlgmr.msra.gmra.mrb[4].mxu0 %vm153_vm1, %v848_v3 }
  0x94   :  { %815 = vmatpush3.bf16.msra.mxu0 %v851_v6  ;;  %818 = vmatprep.mubr.msk.bf16.mxu0 %vm1081_vm0, %v1080_v0 }
  0x95   :  { %816 = vmatprep.subr.bf16.mxu0 %v1080_v0 }
  0x98   :  { %817 = vmatpush3.bf16.msra.mxu0 %v852_v7 }
  0x9b   :  { %819 = vmatmul.mubr.msk.bf16.vlgmr.msra.gmra.mrb[8].mxu0 %vm153_vm1, %v848_v3 }
 0x15e   :  { %v191_v9 = vpop.f32.mrb[0].mxu0 }
 0x15f   :  { %v192_v10 = vadd.f32 %v733_v8, %v191_v9  ;;  %v788_v11 = vpop.f32.mrb[1].mxu0 }
 0x160   :  { %v194_v12 = vpop.f32.mrb[2].mxu0 }
 0x161   :  { %v202_v13 = vmul.f32 0.70710677, %v192_v10  ;;  %v195_v14 = vadd.f32 %v733_v8, %v194_v12  ;;  %v789_v15 = vpop.f32.mrb[3].mxu0  ;;  %v200_v28 = vmul.f32 0.5, %v192_v10 }
 0x163   :  { %859 = verf.f32 %v202_v13  ;;  %v203_v16 = vmul.f32 0.70710677, %v195_v14  ;;  %v201_v34 = vmul.f32 0.5, %v195_v14 }
 0x165   :  { %861 = verf.f32 %v203_v16 }
 0x166   :  { %v382_v18 = vpop.f32.mrb[4].mxu0 }
 0x167   :  { %v383_v19 = vadd.f32 %v744_v17, %v382_v18  ;;  %v804_v20 = vpop.f32.mrb[5].mxu0 }
 0x168   :  { %v385_v21 = vpop.f32.mrb[6].mxu0 }
 0x169   :  { %v395_v22 = vmul.f32 0.70710677, %v383_v19  ;;  %v386_v23 = vadd.f32 %v744_v17, %v385_v21  ;;  %v805_v24 = vpop.f32.mrb[7].mxu0  ;;  %v393_v45 = vmul.f32 0.5, %v383_v19 }
 0x16b   :  { %863 = verf.f32 %v395_v22  ;;  %v396_v25 = vmul.f32 0.70710677, %v386_v23  ;;  %v394_v49 = vmul.f32 0.5, %v386_v23 }
 0x16d   :  { %v860_v27 = vpop.eup %859  ;;  %865 = verf.f32 %v396_v25 }
 0x16e   :  { %v577_v29 = vpop.f32.mrb[8].mxu0  ;;  %v206_v30 = vadd.f32 1.0, %v860_v27 }
 0x16f   :  { %v862_v31 = vpop.eup %861  ;;  %v578_v32 = vadd.f32 %v754_v26, %v577_v29  ;;  %v820_v33 = vpop.f32.mrb[9].mxu0 }
 0x170   :  { %v580_v35 = vpop.f32.mrb[10].mxu0  ;;  %v208_v36 = vmul.f32 %v206_v30, %v200_v28  ;;  %v207_v37 = vadd.f32 1.0, %v862_v31  ;;  %v854_v33 = vld [vmem:[#allocation11 + $0x8] sm:$0xff]  }
 0x171   :  { %v590_v38 = vmul.f32 0.70710677, %v578_v32  ;;  %v581_v39 = vadd.f32 %v754_v26, %v580_v35  ;;  %v821_v40 = vpop.f32.mrb[11].mxu0  ;;  %v588_v55 = vmul.f32 0.5, %v578_v32  ;;  %v853_v32 = vld [vmem:[#allocation11] sm:$0xff]  }
 0x172   :  { %v210_v41 = vsel %vm153_vm1, %v208_v36, 0.0  ;;  %v209_v42 = vmul.f32 %v207_v37, %v201_v34  ;;  %791 = vmatpush3.bf16.msra.mxu1 %v853_v32 }
 0x173   :  { %867 = verf.f32 %v590_v38  ;;  %v591_v43 = vmul.f32 0.70710677, %v581_v39  ;;  %211 = vadd.xlane.f32.xlu0 %v210_v41  ;;  %v589_v59 = vmul.f32 0.5, %v581_v39  ;;  %792 = vmatprep.subr.bf16.mxu1 %v1080_v0 }
 0x174   :  { %v213_v46 = vsel %vm153_vm1, %v209_v42, 0.0 }
 0x175   :  { %v864_v44 = vpop.eup %863  ;;  %869 = verf.f32 %v591_v43 }
 0x176   :  { %v399_v47 = vadd.f32 1.0, %v864_v44  ;;  %793 = vmatpush3.bf16.msra.mxu1 %v854_v33  ;;  %v750_v33 = vld [vmem:[#allocation13 + $0x1] ss:$0 sm:$0xff] }
 0x177   :  { %v866_v48 = vpop.eup %865  ;;  %214 = vadd.xlane.f32.xlu0 %v213_v46  ;;  %806 = vmatprep.subr.bf16.mxu1 %v1080_v0 }
 0x178   :  { %v401_v50 = vmul.f32 %v399_v47, %v393_v45  ;;  %v400_v51 = vadd.f32 1.0, %v866_v48 }
 0x17a   :  { %v403_v52 = vsel %vm153_vm1, %v401_v50, 0.0  ;;  %v402_v53 = vmul.f32 %v400_v51, %v394_v49 }
 0x17b   :  { %404 = vadd.xlane.f32.xlu1 %v403_v52 }
 0x17c   :  { %v406_v56 = vsel %vm153_vm1, %v402_v53, 0.0 }
 0x17d   :  { %v868_v54 = vpop.eup %867 }
 0x17e   :  { %v594_v57 = vadd.f32 1.0, %v868_v54 }
 0x17f   :  { %v870_v58 = vpop.eup %869  ;;  %407 = vadd.xlane.f32.xlu1 %v406_v56 }
 0x180   :  { %v596_v60 = vmul.f32 %v594_v57, %v588_v55  ;;  %v595_v61 = vadd.f32 1.0, %v870_v58  ;;  %v739_v58 = vld [vmem:[#allocation10] ss:$0 sm:$0xff] }
 0x182   :  { %v598_v62 = vsel %vm153_vm1, %v596_v60, 0.0  ;;  %v597_v63 = vmul.f32 %v595_v61, %v589_v59 }
 0x183   :  { %599 = vadd.xlane.f32.xlu0 %v598_v62 }
 0x184   :  { %v601_v1 = vsel %vm153_vm1, %v597_v63, 0.0 }
 0x185   :  { %602 = vadd.xlane.f32.xlu1 %v601_v1  ;;  %v748_v1 = vld [vmem:[#allocation8 + $0x1] ss:$0 sm:$0xff] }
 0x200   :  { %v212_v2 = vpop.xlane.xlu0 %211 }
 0x201   :  { %v217_v3 = vmul.f32 0.03125, %v212_v2  ;;  %v855_v2 = vld [vmem:[#allocation11 + $0x10] sm:$0xff]  }
 0x203   :  { %v219_v4 = vsub.f32 %v208_v36, %v217_v3 }
 0x204   :  { %v215_v5 = vpop.xlane.xlu0 %214 }
 0x205   :  { %v218_v6 = vmul.f32 0.03125, %v215_v5  ;;  %v221_v7 = vmul.f32 %v219_v4, %v219_v4 }
 0x207   :  { %v220_v8 = vsub.f32 %v209_v42, %v218_v6  ;;  %v223_v9 = vsel %vm153_vm1, %v221_v7, 0.0  ;;  %v856_v7 = vld [vmem:[#allocation11 + $0x18] sm:$0xff]  }
 0x208   :  { %v405_v10 = vpop.xlane.xlu1 %404  ;;  %224 = vadd.xlane.f32.xlu0 %v223_v9 }
 0x209   :  { %v409_v11 = vmul.f32 0.03125, %v405_v10  ;;  %v222_v12 = vmul.f32 %v220_v8, %v220_v8 }
 0x20b   :  { %v1255_v13 = vsub.f32 %v401_v50, %v409_v11  ;;  %v226_v14 = vsel %vm153_vm1, %v222_v12, 0.0  ;;  %v738_v50 = vld [vmem:[#allocation8] ss:$0 sm:$0xff] }
 0x20c   :  { %v408_v15 = vpop.xlane.xlu1 %407  ;;  %227 = vadd.xlane.f32.xlu1 %v226_v14 }
 0x20d   :  { %v410_v16 = vmul.f32 0.03125, %v408_v15  ;;  %v413_v17 = vmul.f32 %v1255_v13, %v1255_v13  ;;  %v758_v15 = vld [vmem:[#allocation8 + $0x2] ss:$0 sm:$0xff] }
 0x20f   :  { %v1260_v18 = vsub.f32 %v402_v53, %v410_v16  ;;  %v415_v19 = vsel %vm153_vm1, %v413_v17, 0.0  ;;  %v857_v16 = vld [vmem:[#allocation11 + $0x20] sm:$0xff]  }
 0x210   :  { %416 = vadd.xlane.f32.xlu0 %v415_v19  ;;  %v600_v20 = vpop.xlane.xlu0 %599 }
 0x211   :  { %v604_v21 = vmul.f32 0.03125, %v600_v20  ;;  %v414_v22 = vmul.f32 %v1260_v18, %v1260_v18 }
 0x212   :  { %v603_v23 = vpop.xlane.xlu1 %602 }
 0x213   :  { %v1265_v24 = vsub.f32 %v596_v60, %v604_v21  ;;  %v605_v25 = vmul.f32 0.03125, %v603_v23  ;;  %v418_v26 = vsel %vm153_vm1, %v414_v22, 0.0  ;;  %v858_v21 = vld [vmem:[#allocation11 + $0x28] sm:$0xff]   ;;  %v759_v22 = vld [vmem:[#allocation10 + $0x2] ss:$0 sm:$0xff] }
 0x214   :  { %419 = vadd.xlane.f32.xlu1 %v418_v26  ;;  %v740_v26 = vld [vmem:[#allocation13] ss:$0 sm:$0xff] }
 0x215   :  { %v1268_v27 = vsub.f32 %v597_v63, %v605_v25  ;;  %v608_v28 = vmul.f32 %v1265_v24, %v1265_v24 }
 0x217   :  { %v610_v29 = vsel %vm153_vm1, %v608_v28, 0.0  ;;  %v609_v30 = vmul.f32 %v1268_v27, %v1268_v27 }
 0x218   :  { %611 = vadd.xlane.f32.xlu0 %v610_v29 }
 0x219   :  { %v613_v31 = vsel %vm153_vm1, %v609_v30, 0.0 }
 0x21a   :  { %614 = vadd.xlane.f32.xlu1 %v613_v31 }
 0x295   :  { %v225_v34 = vpop.xlane.xlu0 %224 }
 0x296   :  { %v229_v35 = vmul.f32 0.03125, %v225_v34 }
 0x298   :  { %v231_v36 = vadd.f32 1e-05, %v229_v35 }
 0x299   :  { %v228_v37 = vpop.xlane.xlu1 %227 }
 0x29a   :  { %871 = vrsqrt.f32 %v231_v36  ;;  %v230_v38 = vmul.f32 0.03125, %v228_v37 }
 0x29c   :  { %v232_v39 = vadd.f32 1e-05, %v230_v38 }
 0x29d   :  { %v417_v40 = vpop.xlane.xlu0 %416 }
 0x29e   :  { %873 = vrsqrt.f32 %v232_v39  ;;  %v421_v41 = vmul.f32 0.03125, %v417_v40  ;;  %v760_v39 = vld [vmem:[#allocation13 + $0x2] ss:$0 sm:$0xff] }
 0x2a0   :  { %v423_v42 = vadd.f32 1e-05, %v421_v41 }
 0x2a1   :  { %v420_v43 = vpop.xlane.xlu1 %419 }
 0x2a2   :  { %875 = vrsqrt.f32 %v423_v42  ;;  %v422_v44 = vmul.f32 0.03125, %v420_v43 }
 0x2a4   :  { %v872_v45 = vpop.eup %871  ;;  %v424_v46 = vadd.f32 1e-05, %v422_v44 }
 0x2a5   :  { %v235_v47 = vmul.f32 %v872_v45, %v219_v4  ;;  %v612_v48 = vpop.xlane.xlu0 %611 }
 0x2a6   :  { %877 = vrsqrt.f32 %v424_v46  ;;  %v616_v49 = vmul.f32 0.03125, %v612_v48 }
 0x2a7   :  { %v615_v51 = vpop.xlane.xlu1 %614  ;;  %v243_v56 = vmul.f32 %v738_v50, %v235_v47 }
 0x2a8   :  { %v874_v52 = vpop.eup %873  ;;  %v618_v53 = vadd.f32 1e-05, %v616_v49  ;;  %v617_v54 = vmul.f32 0.03125, %v615_v51 }
 0x2a9   :  { %v236_v55 = vmul.f32 %v874_v52, %v220_v8  ;;  %v251_v62 = vadd.f32 %v739_v58, %v243_v56  ;;  %v749_v8 = vld [vmem:[#allocation10 + $0x1] ss:$0 sm:$0xff] }
 0x2aa   :  { %879 = vrsqrt.f32 %v618_v53  ;;  %v619_v57 = vadd.f32 1e-05, %v617_v54 }
 0x2ab   :  { %v244_v59 = vmul.f32 %v738_v50, %v236_v55 }
 0x2ac   :  { %v876_v60 = vpop.eup %875  ;;  %881 = vrsqrt.f32 %v619_v57 }
 0x2ad   :  { %v427_v61 = vmul.f32 %v876_v60, %v1255_v13  ;;  %v252_v63 = vadd.f32 %v739_v58, %v244_v59 }
 0x2af   :  { %v253_v3 = vpack.c.bf16 %v252_v63, %v251_v62  ;;  %v435_v5 = vmul.f32 %v748_v1, %v427_v61 }
 0x2b0   :  { %v878_v4 = vpop.eup %877 }
 0x2b1   :  { %v428_v6 = vmul.f32 %v878_v4, %v1260_v18  ;;  %795 = vmatmul.mubr.msk.bf16.vlgmr.msra.gmra.mrb[0].mxu1 %vm153_vm1, %v253_v3  ;;  %v443_v12 = vadd.f32 %v749_v8, %v435_v5 }
 0x2b2   :  { %807 = vmatpush3.bf16.msra.mxu1 %v855_v2  ;;  %810 = vmatprep.mubr.msk.bf16.mxu1 %vm1081_vm0, %v1080_v0 }
 0x2b3   :  { %v436_v9 = vmul.f32 %v748_v1, %v428_v6  ;;  %808 = vmatprep.subr.bf16.mxu1 %v1080_v0 }
 0x2b4   :  { %v880_v10 = vpop.eup %879 }
 0x2b5   :  { %v622_v11 = vmul.f32 %v880_v10, %v1265_v24  ;;  %v444_v13 = vadd.f32 %v749_v8, %v436_v9 }
 0x2b6   :  { %v882_v14 = vpop.eup %881  ;;  %809 = vmatpush3.bf16.msra.mxu1 %v856_v7 }
 0x2b7   :  { %v623_v17 = vmul.f32 %v882_v14, %v1268_v27  ;;  %v445_v18 = vpack.c.bf16 %v444_v13, %v443_v12  ;;  %822 = vmatprep.subr.bf16.mxu1 %v1080_v0  ;;  %v630_v19 = vmul.f32 %v758_v15, %v622_v11 }
 0x2b9   :  { %v631_v20 = vmul.f32 %v758_v15, %v623_v17  ;;  %811 = vmatmul.mubr.msk.bf16.vlgmr.msra.gmra.mrb[4].mxu1 %vm153_vm1, %v445_v18  ;;  %v638_v24 = vadd.f32 %v759_v22, %v630_v19 }
 0x2ba   :  { %823 = vmatpush3.bf16.msra.mxu1 %v857_v16  ;;  %826 = vmatprep.mubr.msk.bf16.mxu1 %vm1081_vm0, %v1080_v0 }
 0x2bb   :  { %824 = vmatprep.subr.bf16.mxu1 %v1080_v0  ;;  %v639_v23 = vadd.f32 %v759_v22, %v631_v20 }
 0x2bd   :  { %v640_v25 = vpack.c.bf16 %v639_v23, %v638_v24 }
 0x2be   :  { %825 = vmatpush3.bf16.msra.mxu1 %v858_v21 }
 0x2c1   :  { %827 = vmatmul.mubr.msk.bf16.vlgmr.msra.gmra.mrb[8].mxu1 %vm153_vm1, %v640_v25 }
 0x384   :  { %v314_v27 = vpop.f32.mrb[0].mxu1 }
 0x385   :  { %v315_v28 = vadd.f32 %v740_v26, %v314_v27  ;;  %v796_v29 = vpop.f32.mrb[1].mxu1 }
 0x386   :  { %v317_v30 = vpop.f32.mrb[2].mxu1 }
 0x387   :  { %321 = vst [vmem:[#allocation14] sm:$0xff] %v315_v28  ;;  %v318_v31 = vadd.f32 %v740_v26, %v317_v30  ;;  %v797_v32 = vpop.f32.mrb[3].mxu1 }
 0x389   :  { %322 = vst [vmem:[#allocation14 + $0x8] sm:$0xff] %v318_v31 }
 0x38c   :  { %v508_v34 = vpop.f32.mrb[4].mxu1 }
 0x38d   :  { %v509_v35 = vadd.f32 %v750_v33, %v508_v34  ;;  %v812_v36 = vpop.f32.mrb[5].mxu1 }
 0x38e   :  { %v511_v0 = vpop.f32.mrb[6].mxu1 }
 0x38f   :  { %516 = vst [vmem:[#allocation14 + $0x10] sm:$0xff] %v509_v35  ;;  %v512_v37 = vadd.f32 %v750_v33, %v511_v0  ;;  %v813_v38 = vpop.f32.mrb[7].mxu1 }
 0x391   :  { %517 = vst [vmem:[#allocation14 + $0x18] sm:$0xff] %v512_v37 }
 0x394   :  { %v703_v40 = vpop.f32.mrb[8].mxu1 }
 0x395   :  { %v704_v41 = vadd.f32 %v760_v39, %v703_v40  ;;  %v828_v42 = vpop.f32.mrb[9].mxu1 }
 0x396   :  { %v706_v43 = vpop.f32.mrb[10].mxu1 }
 0x397   :  { %711 = vst [vmem:[#allocation14 + $0x20] sm:$0xff] %v704_v41  ;;  %v707_v44 = vadd.f32 %v760_v39, %v706_v43  ;;  %v829_v45 = vpop.f32.mrb[11].mxu1 }
 0x399   :  { %712 = vst [vmem:[#allocation14 + $0x28] sm:$0xff] %v707_v44 }
 0x39a   :  { %1048 = shalt.err (!%p1045_p4)
}
 0x39b   :  { %s1049_s21 = scalar_lea.hbm %s1311_s7, 768 }
 0x39c   :  { %p1050_p5 = scmp.ne.s32.totalorder %s1311_s7, %s1049_s21  ;;  %p1053_p6 = scmp.lt.u32.totalorder %s1049_s21, %s1311_s7 }
 0x39e   :  { %p1055_p7 = pnand %p1053_p6, %p1050_p5 }
 0x3a0   :  { %1058 = shalt.err (!%p1055_p7)
}
 0x3a1   :  { %s1083_s25 = smov 128   ;;  %s1084_s29 = smov 8  }
 0x3a2   :  { %724 = dma.vmem_to_hbm [thread:$0]  %s719_s27, 768, %s1311_s7, [#allocation4], %s1083_s25, %s1083_s25, %s1084_s29  }
 0x3a3   :  { %1067 = dma.done.wait [#allocation4], 768  }
 0x3a4   :  { %1068 = vsyncadd [#allocation4], 4294966528 }
 0x3a5   :  { %728 = vsyncpa [#allocation3], 1 }
 0x3a6   :  { %729 = vsyncpa [#allocation6], 1 }
 0x3a7   :  { %730 = vsyncpa [#allocation9], 1 }
 0x3a8   :  { %731 = vsyncpa [#allocation12], 1 }
 0x3a9   :  { %732 = vsyncpa [#allocation4], 1 }

// kernel: tpu_custom_call.1
= control target key start
LH: loop header
LB: loop body
LE: loop exit
PB: predicated region body
PF: predicated region fallthrough
CT: control target
= control target key end

     0   :  { %12 = vsyncpa [#allocation3], 0  ;;  %s1304_s0 = inlined_call_operand.hbm [shape: bf16[16,32], index: 0, kind: input, shape index: {}]   ;;  %s1305_s1 = inlined_call_operand.hbm [shape: bf16[3,32,32], index: 1, kind: input, shape index: {}]   ;;  %s1306_s2 = inlined_call_operand.hbm [shape: f32[3,1,32], index: 2, kind: input, shape index: {}]   ;;  %s1307_s3 = inlined_call_operand.hbm [shape: f32[3,1,32], index: 3, kind: input, shape index: {}]   ;;  %s1308_s4 = inlined_call_operand.hbm [shape: f32[3,1,32], index: 4, kind: input, shape index: {}]   ;;  %s1309_s5 = inlined_call_operand.hbm [shape: bf16[3,32,128], index: 5, kind: input, shape index: {}]   ;;  %s1310_s6 = inlined_call_operand.hbm [shape: f32[3,1,128], index: 6, kind: input, shape index: {}]   ;;  %s1311_s7 = inlined_call_operand.hbm [shape: f32[3,16,128], index: 7, kind: output, shape index: {}]  }
   0x1   :  { %13 = vsyncpa [#allocation6], 0 }
   0x2   :  { %14 = vsyncpa [#allocation9], 0 }
   0x3   :  { %15 = vsyncpa [#allocation12], 0 }
   0x4   :  { %16 = vsyncpa [#allocation4], 0  ;;  %s1069_s24 = smov [#allocation5]   ;;  %s883_s28 = scalar_lea.hbm %s1305_s1, 768 }
   0x5   :  { %s34_s25 = sshll.u32 %s1069_s24, 4  ;;  %p884_p0 = scmp.ne.s32.totalorder %s1305_s1, %s883_s28  ;;  %s35_s25 = int_to_ptr.vmem [resolvable:$true] %s34_s25 }
   0x6   :  { %p887_p1 = scmp.lt.u32.totalorder %s883_s28, %s1305_s1 }
   0x8   :  { %p889_p2 = pnand %p887_p1, %p884_p0 }
   0xa   :  { %892 = shalt.err (!%p889_p2)
}
   0xb   :  { %s893_s10 = scalar_lea.vmem %s35_s25, 768  ;;  %p898_p4 = scmp.lt.s32.totalorder %s35_s25, %s35_s25 }
   0xc   :  { %p894_p3 = scmp.ne.s32.totalorder %s35_s25, %s893_s10  ;;  %p899_p5 = scmp.lt.s32.totalorder %s893_s10, %s893_s10 }
   0xe   :  { %p900_p6 = por %p899_p5, %p898_p4 }
  0x10   :  { %p901_p7 = pnand %p900_p6, %p894_p3 }
  0x12   :  { %904 = shalt.err (!%p901_p7)
}
  0x13   :  { %s1070_s11 = smov 64   ;;  %s1071_s12 = smov 4  }
  0x14   :  { %40 = dma.hbm_to_vmem [thread:$0]  %s1305_s1, 768, %s35_s25, [#allocation6], %s1070_s11, %s1070_s11, %s1071_s12  }
  0x15   :  { %s1072_s15 = smov [#allocation8]   ;;  %s1073_s17 = smov [#allocation11]  }
  0x16   :  { %s58_s16 = sshll.u32 %s1072_s15, 4  ;;  %s82_s18 = sshll.u32 %s1073_s17, 4  ;;  %s59_s16 = int_to_ptr.vmem [resolvable:$true] %s58_s16  ;;  %s83_s18 = int_to_ptr.vmem [resolvable:$true] %s82_s18 }
  0x17   :  { %s905_s21 = scalar_lea.hbm %s1307_s3, 48 }
  0x18   :  { %p906_p8 = scmp.ne.s32.totalorder %s1307_s3, %s905_s21  ;;  %p909_p9 = scmp.lt.u32.totalorder %s905_s21, %s1307_s3 }
  0x1a   :  { %p911_p10 = pnand %p909_p9, %p906_p8 }
  0x1c   :  { %914 = shalt.err (!%p911_p10)
}
  0x1d   :  { %s915_s1 = scalar_lea.vmem %s59_s16, 48  ;;  %s919_s25 = scalar_lea.vmem %s59_s16, 64 }
  0x1e   :  { %p916_p11 = scmp.ne.s32.totalorder %s59_s16, %s915_s1  ;;  %p920_p12 = scmp.lt.s32.totalorder %s59_s16, %s59_s16 }
  0x1f   :  { %p921_p13 = scmp.lt.s32.totalorder %s919_s25, %s915_s1 }
  0x21   :  { %p922_p0 = por %p921_p13, %p920_p12 }
  0x23   :  { %p923_p1 = pnand %p922_p0, %p916_p11 }
  0x25   :  { %926 = shalt.err (!%p923_p1)
}
  0x26   :  { %s1074_s27 = smov 16   ;;  %s1075_s28 = smov 1  }
  0x27   :  { %64 = dma.hbm_to_vmem [thread:$0]  %s1307_s3, 48, %s59_s16, [#allocation9], %s1074_s27, %s1074_s27, %s1075_s28  }
  0x28   :  { %s927_s10 = scalar_lea.hbm %s1309_s5, 768 }
  0x29   :  { %p928_p2 = scmp.ne.s32.totalorder %s1309_s5, %s927_s10  ;;  %p931_p3 = scmp.lt.u32.totalorder %s927_s10, %s1309_s5 }
  0x2b   :  { %p933_p4 = pnand %p931_p3, %p928_p2 }
  0x2d   :  { %936 = shalt.err (!%p933_p4)
}
  0x2e   :  { %s937_s19 = scalar_lea.vmem %s83_s18, 768  ;;  %p942_p6 = scmp.lt.s32.totalorder %s83_s18, %s83_s18 }
  0x2f   :  { %p938_p5 = scmp.ne.s32.totalorder %s83_s18, %s937_s19  ;;  %p943_p7 = scmp.lt.s32.totalorder %s937_s19, %s937_s19 }
  0x31   :  { %p944_p8 = por %p943_p7, %p942_p6 }
  0x33   :  { %p945_p9 = pnand %p944_p8, %p938_p5 }
  0x35   :  { %948 = shalt.err (!%p945_p9)
}
  0x36   :  { %88 = dma.hbm_to_vmem [thread:$0]  %s1309_s5, 768, %s83_s18, [#allocation12], %s1070_s11, %s1070_s11, %s1071_s12  }
  0x37   :  { %s1076_s20 = smov [#allocation2]   ;;  %s1077_s22 = smov [#allocation7]  }
  0x38   :  { %s22_s21 = sshll.u32 %s1076_s20, 4  ;;  %s46_s23 = sshll.u32 %s1077_s22, 4  ;;  %s23_s21 = int_to_ptr.vmem [resolvable:$true] %s22_s21  ;;  %s47_s23 = int_to_ptr.vmem [resolvable:$true] %s46_s23 }
  0x39   :  { %s949_s1 = scalar_lea.hbm %s1304_s0, 128 }
  0x3a   :  { %p950_p10 = scmp.ne.s32.totalorder %s1304_s0, %s949_s1  ;;  %p953_p11 = scmp.lt.u32.totalorder %s949_s1, %s1304_s0 }
  0x3c   :  { %p955_p12 = pnand %p953_p11, %p950_p10 }
  0x3e   :  { %958 = shalt.err (!%p955_p12)
}
  0x3f   :  { %s959_s5 = scalar_lea.vmem %s23_s21, 128  ;;  %p964_p0 = scmp.lt.s32.totalorder %s23_s21, %s23_s21 }
  0x40   :  { %p960_p13 = scmp.ne.s32.totalorder %s23_s21, %s959_s5  ;;  %p965_p1 = scmp.lt.s32.totalorder %s959_s5, %s959_s5 }
  0x42   :  { %p966_p2 = por %p965_p1, %p964_p0 }
  0x44   :  { %p967_p3 = pnand %p966_p2, %p960_p13 }
  0x46   :  { %970 = shalt.err (!%p967_p3)
}
  0x47   :  { %28 = dma.hbm_to_vmem [thread:$0]  %s1304_s0, 128, %s23_s21, [#allocation3], %s1070_s11, %s1070_s11, %s1071_s12  }
  0x48   :  { %s971_s14 = scalar_lea.hbm %s1306_s2, 48 }
  0x49   :  { %p972_p4 = scmp.ne.s32.totalorder %s1306_s2, %s971_s14  ;;  %p975_p5 = scmp.lt.u32.totalorder %s971_s14, %s1306_s2 }
  0x4b   :  { %p977_p6 = pnand %p975_p5, %p972_p4 }
  0x4d   :  { %980 = shalt.err (!%p977_p6)
}
  0x4e   :  { %s981_s16 = scalar_lea.vmem %s47_s23, 48  ;;  %s985_s20 = scalar_lea.vmem %s47_s23, 64 }
  0x4f   :  { %p982_p7 = scmp.ne.s32.totalorder %s47_s23, %s981_s16  ;;  %p986_p8 = scmp.lt.s32.totalorder %s47_s23, %s47_s23 }
  0x50   :  { %p987_p9 = scmp.lt.s32.totalorder %s985_s20, %s981_s16 }
  0x52   :  { %p988_p10 = por %p987_p9, %p986_p8 }
  0x54   :  { %p989_p11 = pnand %p988_p10, %p982_p7 }
  0x56   :  { %992 = shalt.err (!%p989_p11)
}
  0x57   :  { %52 = dma.hbm_to_vmem [thread:$0]  %s1306_s2, 48, %s47_s23, [#allocation6], %s1074_s27, %s1074_s27, %s1075_s28  }
  0x58   :  { %s1078_s12 = smov [#allocation10]   ;;  %s1079_s22 = smov [#allocation13]  }
  0x59   :  { %s70_s21 = sshll.u32 %s1078_s12, 4  ;;  %s94_s24 = sshll.u32 %s1079_s22, 4  ;;  %s71_s21 = int_to_ptr.vmem [resolvable:$true] %s70_s21  ;;  %s95_s24 = int_to_ptr.vmem [resolvable:$true] %s94_s24 }
  0x5a   :  { %s993_s25 = scalar_lea.hbm %s1308_s4, 48 }
  0x5b   :  { %p994_p12 = scmp.ne.s32.totalorder %s1308_s4, %s993_s25  ;;  %p997_p13 = scmp.lt.u32.totalorder %s993_s25, %s1308_s4 }
  0x5d   :  { %p999_p0 = pnand %p997_p13, %p994_p12 }
  0x5f   :  { %1002 = shalt.err (!%p999_p0)
}
  0x60   :  { %s1003_s2 = scalar_lea.vmem %s71_s21, 48  ;;  %s1007_s23 = scalar_lea.vmem %s71_s21, 64 }
  0x61   :  { %p1004_p1 = scmp.ne.s32.totalorder %s71_s21, %s1003_s2  ;;  %p1008_p2 = scmp.lt.s32.totalorder %s71_s21, %s71_s21 }
  0x62   :  { %p1009_p3 = scmp.lt.s32.totalorder %s1007_s23, %s1003_s2 }
  0x64   :  { %p1010_p4 = por %p1009_p3, %p1008_p2 }
  0x66   :  { %p1011_p5 = pnand %p1010_p4, %p1004_p1 }
  0x68   :  { %1014 = shalt.err (!%p1011_p5)
}
  0x69   :  { %76 = dma.hbm_to_vmem [thread:$0]  %s1308_s4, 48, %s71_s21, [#allocation9], %s1074_s27, %s1074_s27, %s1075_s28  }
  0x6a   :  { %s1015_s14 = scalar_lea.hbm %s1310_s6, 48 }
  0x6b   :  { %p1016_p6 = scmp.ne.s32.totalorder %s1310_s6, %s1015_s14  ;;  %p1019_p7 = scmp.lt.u32.totalorder %s1015_s14, %s1310_s6 }
  0x6d   :  { %p1021_p8 = pnand %p1019_p7, %p1016_p6 }
  0x6f   :  { %1024 = shalt.err (!%p1021_p8)
}
  0x70   :  { %s1025_s16 = scalar_lea.vmem %s95_s24, 48  ;;  %s1029_s20 = scalar_lea.vmem %s95_s24, 64 }
  0x71   :  { %p1026_p9 = scmp.ne.s32.totalorder %s95_s24, %s1025_s16  ;;  %p1030_p10 = scmp.lt.s32.totalorder %s95_s24, %s95_s24 }
  0x72   :  { %p1031_p11 = scmp.lt.s32.totalorder %s1029_s20, %s1025_s16 }
  0x74   :  { %p1032_p12 = por %p1031_p11, %p1030_p10 }
  0x76   :  { %p1033_p13 = pnand %p1032_p12, %p1026_p9 }
  0x78   :  { %1036 = shalt.err (!%p1033_p13)
}
  0x79   :  { %100 = dma.hbm_to_vmem [thread:$0]  %s1310_s6, 48, %s95_s24, [#allocation12], %s1074_s27, %s1074_s27, %s1075_s28  }
  0x7a   :  { %1059 = dma.done.wait [#allocation3], 128  }
  0x7b   :  { %1060 = vsyncadd [#allocation3], 4294967168 }
  0x7c   :  { %1061 = dma.done.wait [#allocation6], 816  }
  0x7d   :  { %1062 = vsyncadd [#allocation6], 4294966480 }
  0x7e   :  { %1063 = dma.done.wait [#allocation9], 96  }
  0x7f   :  { %1064 = vsyncadd [#allocation9], 4294967200 }
  0x80   :  { %1065 = dma.done.wait [#allocation12], 816  }
  0x81   :  { %1066 = vsyncadd [#allocation12], 4294966480  ;;  %v1080_v0 = vmov 0.0   ;;  %vm1081_vm0 = vmmov 0   ;;  %v846_v1 = vld [vmem:[#allocation5] sm:$0xff]   ;;  %v847_v2 = vld [vmem:[#allocation5 + $0x8] sm:$0xff]  }
  0x82   :  { %782 = vmatprep.subr.bf16.mxu0 %v1080_v0  ;;  %786 = vmatprep.mubr.msk.bf16.mxu0 %vm1081_vm0, %v1080_v0  ;;  %v848_v3 = vld [vmem:[#allocation2] sm:$0xff]   ;;  %vm153_vm1 = vcmask 261120   ;;  %v849_v4 = vld [vmem:[#allocation5 + $0x10] sm:$0xff]   ;;  %v851_v6 = vld [vmem:[#allocation5 + $0x20] sm:$0xff]   ;;  %s1082_s6 = smov [#allocation14]  }
  0x83   :  { %790 = vmatprep.subr.bf16.mxu1 %v1080_v0  ;;  %794 = vmatprep.mubr.msk.bf16.mxu1 %vm1081_vm0, %v1080_v0  ;;  %v850_v5 = vld [vmem:[#allocation5 + $0x18] sm:$0xff]   ;;  %v852_v7 = vld [vmem:[#allocation5 + $0x28] sm:$0xff]   ;;  %v733_v8 = vld [vmem:[#allocation7] ss:$0 sm:$0xff]  ;;  %s718_s27 = sshll.u32 %s1082_s6, 4  ;;  %s719_s27 = int_to_ptr.vmem [resolvable:$true] %s718_s27 }
  0x84   :  { %783 = vmatpush3.bf16.msra.mxu0 %v846_v1  ;;  %v744_v17 = vld [vmem:[#allocation7 + $0x1] ss:$0 sm:$0xff]  ;;  %v754_v26 = vld [vmem:[#allocation7 + $0x2] ss:$0 sm:$0xff]  ;;  %s1037_s28 = scalar_lea.vmem %s719_s27, 768  ;;  %p1042_p1 = scmp.lt.s32.totalorder %s719_s27, %s719_s27 }
  0x85   :  { %784 = vmatprep.subr.bf16.mxu0 %v1080_v0  ;;  %p1038_p0 = scmp.ne.s32.totalorder %s719_s27, %s1037_s28  ;;  %p1043_p2 = scmp.lt.s32.totalorder %s1037_s28, %s1037_s28 }
  0x87   :  { %p1044_p3 = por %p1043_p2, %p1042_p1 }
  0x88   :  { %785 = vmatpush3.bf16.msra.mxu0 %v847_v2 }
  0x89   :  { %798 = vmatprep.subr.bf16.mxu0 %v1080_v0  ;;  %p1045_p4 = pnand %p1044_p3, %p1038_p0 }
  0x8b   :  { %787 = vmatmul.mubr.msk.bf16.vlgmr.msra.gmra.mrb[0].mxu0 %vm153_vm1, %v848_v3 }
  0x8c   :  { %799 = vmatpush3.bf16.msra.mxu0 %v849_v4  ;;  %802 = vmatprep.mubr.msk.bf16.mxu0 %vm1081_vm0, %v1080_v0 }
  0x8d   :  { %800 = vmatprep.subr.bf16.mxu0 %v1080_v0 }
  0x90   :  { %801 = vmatpush3.bf16.msra.mxu0 %v850_v5 }
  0x91   :  { %814 = vmatprep.subr.bf16.mxu0 %v1080_v0 }
  0x93   :  { %803 = vmatmul.mubr.msk.bf16.vlgmr.msra.gmra.mrb[4].mxu0 %vm153_vm1, %v848_v3 }
  0x94   :  { %815 = vmatpush3.bf16.msra.mxu0 %v851_v6  ;;  %818 = vmatprep.mubr.msk.bf16.mxu0 %vm1081_vm0, %v1080_v0 }
  0x95   :  { %816 = vmatprep.subr.bf16.mxu0 %v1080_v0 }
  0x98   :  { %817 = vmatpush3.bf16.msra.mxu0 %v852_v7 }
  0x9b   :  { %819 = vmatmul.mubr.msk.bf16.vlgmr.msra.gmra.mrb[8].mxu0 %vm153_vm1, %v848_v3 }
 0x15e   :  { %v191_v9 = vpop.f32.mrb[0].mxu0 }
 0x15f   :  { %v192_v10 = vadd.f32 %v733_v8, %v191_v9  ;;  %v788_v11 = vpop.f32.mrb[1].mxu0 }
 0x160   :  { %v194_v12 = vpop.f32.mrb[2].mxu0 }
 0x161   :  { %v202_v13 = vmul.f32 0.70710677, %v192_v10  ;;  %v195_v14 = vadd.f32 %v733_v8, %v194_v12  ;;  %v789_v15 = vpop.f32.mrb[3].mxu0  ;;  %v200_v28 = vmul.f32 0.5, %v192_v10 }
 0x163   :  { %859 = verf.f32 %v202_v13  ;;  %v203_v16 = vmul.f32 0.70710677, %v195_v14  ;;  %v201_v34 = vmul.f32 0.5, %v195_v14 }
 0x165   :  { %861 = verf.f32 %v203_v16 }
 0x166   :  { %v382_v18 = vpop.f32.mrb[4].mxu0 }
 0x167   :  { %v383_v19 = vadd.f32 %v744_v17, %v382_v18  ;;  %v804_v20 = vpop.f32.mrb[5].mxu0 }
 0x168   :  { %v385_v21 = vpop.f32.mrb[6].mxu0 }
 0x169   :  { %v395_v22 = vmul.f32 0.70710677, %v383_v19  ;;  %v386_v23 = vadd.f32 %v744_v17, %v385_v21  ;;  %v805_v24 = vpop.f32.mrb[7].mxu0  ;;  %v393_v45 = vmul.f32 0.5, %v383_v19 }
 0x16b   :  { %863 = verf.f32 %v395_v22  ;;  %v396_v25 = vmul.f32 0.70710677, %v386_v23  ;;  %v394_v49 = vmul.f32 0.5, %v386_v23 }
 0x16d   :  { %v860_v27 = vpop.eup %859  ;;  %865 = verf.f32 %v396_v25 }
 0x16e   :  { %v577_v29 = vpop.f32.mrb[8].mxu0  ;;  %v206_v30 = vadd.f32 1.0, %v860_v27 }
 0x16f   :  { %v862_v31 = vpop.eup %861  ;;  %v578_v32 = vadd.f32 %v754_v26, %v577_v29  ;;  %v820_v33 = vpop.f32.mrb[9].mxu0 }
 0x170   :  { %v580_v35 = vpop.f32.mrb[10].mxu0  ;;  %v208_v36 = vmul.f32 %v206_v30, %v200_v28  ;;  %v207_v37 = vadd.f32 1.0, %v862_v31  ;;  %v854_v33 = vld [vmem:[#allocation11 + $0x8] sm:$0xff]  }
 0x171   :  { %v590_v38 = vmul.f32 0.70710677, %v578_v32  ;;  %v581_v39 = vadd.f32 %v754_v26, %v580_v35  ;;  %v821_v40 = vpop.f32.mrb[11].mxu0  ;;  %v588_v55 = vmul.f32 0.5, %v578_v32  ;;  %v853_v32 = vld [vmem:[#allocation11] sm:$0xff]  }
 0x172   :  { %v210_v41 = vsel %vm153_vm1, %v208_v36, 0.0  ;;  %v209_v42 = vmul.f32 %v207_v37, %v201_v34  ;;  %791 = vmatpush3.bf16.msra.mxu1 %v853_v32 }
 0x173   :  { %867 = verf.f32 %v590_v38  ;;  %v591_v43 = vmul.f32 0.70710677, %v581_v39  ;;  %211 = vadd.xlane.f32.xlu0 %v210_v41  ;;  %v589_v59 = vmul.f32 0.5, %v581_v39  ;;  %792 = vmatprep.subr.bf16.mxu1 %v1080_v0 }
 0x174   :  { %v213_v46 = vsel %vm153_vm1, %v209_v42, 0.0 }
 0x175   :  { %v864_v44 = vpop.eup %863  ;;  %869 = verf.f32 %v591_v43 }
 0x176   :  { %v399_v47 = vadd.f32 1.0, %v864_v44  ;;  %793 = vmatpush3.bf16.msra.mxu1 %v854_v33  ;;  %v750_v33 = vld [vmem:[#allocation13 + $0x1] ss:$0 sm:$0xff] }
 0x177   :  { %v866_v48 = vpop.eup %865  ;;  %214 = vadd.xlane.f32.xlu0 %v213_v46  ;;  %806 = vmatprep.subr.bf16.mxu1 %v1080_v0 }
 0x178   :  { %v401_v50 = vmul.f32 %v399_v47, %v393_v45  ;;  %v400_v51 = vadd.f32 1.0, %v866_v48 }
 0x17a   :  { %v403_v52 = vsel %vm153_vm1, %v401_v50, 0.0  ;;  %v402_v53 = vmul.f32 %v400_v51, %v394_v49 }
 0x17b   :  { %404 = vadd.xlane.f32.xlu1 %v403_v52 }
 0x17c   :  { %v406_v56 = vsel %vm153_vm1, %v402_v53, 0.0 }
 0x17d   :  { %v868_v54 = vpop.eup %867 }
 0x17e   :  { %v594_v57 = vadd.f32 1.0, %v868_v54 }
 0x17f   :  { %v870_v58 = vpop.eup %869  ;;  %407 = vadd.xlane.f32.xlu1 %v406_v56 }
 0x180   :  { %v596_v60 = vmul.f32 %v594_v57, %v588_v55  ;;  %v595_v61 = vadd.f32 1.0, %v870_v58  ;;  %v739_v58 = vld [vmem:[#allocation10] ss:$0 sm:$0xff] }
 0x182   :  { %v598_v62 = vsel %vm153_vm1, %v596_v60, 0.0  ;;  %v597_v63 = vmul.f32 %v595_v61, %v589_v59 }
 0x183   :  { %599 = vadd.xlane.f32.xlu0 %v598_v62 }
 0x184   :  { %v601_v1 = vsel %vm153_vm1, %v597_v63, 0.0 }
 0x185   :  { %602 = vadd.xlane.f32.xlu1 %v601_v1  ;;  %v748_v1 = vld [vmem:[#allocation8 + $0x1] ss:$0 sm:$0xff] }
 0x200   :  { %v212_v2 = vpop.xlane.xlu0 %211 }
 0x201   :  { %v217_v3 = vmul.f32 0.03125, %v212_v2  ;;  %v855_v2 = vld [vmem:[#allocation11 + $0x10] sm:$0xff]  }
 0x203   :  { %v219_v4 = vsub.f32 %v208_v36, %v217_v3 }
 0x204   :  { %v215_v5 = vpop.xlane.xlu0 %214 }
 0x205   :  { %v218_v6 = vmul.f32 0.03125, %v215_v5  ;;  %v221_v7 = vmul.f32 %v219_v4, %v219_v4 }
 0x207   :  { %v220_v8 = vsub.f32 %v209_v42, %v218_v6  ;;  %v223_v9 = vsel %vm153_vm1, %v221_v7, 0.0  ;;  %v856_v7 = vld [vmem:[#allocation11 + $0x18] sm:$0xff]  }
 0x208   :  { %v405_v10 = vpop.xlane.xlu1 %404  ;;  %224 = vadd.xlane.f32.xlu0 %v223_v9 }
 0x209   :  { %v409_v11 = vmul.f32 0.03125, %v405_v10  ;;  %v222_v12 = vmul.f32 %v220_v8, %v220_v8 }
 0x20b   :  { %v1255_v13 = vsub.f32 %v401_v50, %v409_v11  ;;  %v226_v14 = vsel %vm153_vm1, %v222_v12, 0.0  ;;  %v738_v50 = vld [vmem:[#allocation8] ss:$0 sm:$0xff] }
 0x20c   :  { %v408_v15 = vpop.xlane.xlu1 %407  ;;  %227 = vadd.xlane.f32.xlu1 %v226_v14 }
 0x20d   :  { %v410_v16 = vmul.f32 0.03125, %v408_v15  ;;  %v413_v17 = vmul.f32 %v1255_v13, %v1255_v13  ;;  %v758_v15 = vld [vmem:[#allocation8 + $0x2] ss:$0 sm:$0xff] }
 0x20f   :  { %v1260_v18 = vsub.f32 %v402_v53, %v410_v16  ;;  %v415_v19 = vsel %vm153_vm1, %v413_v17, 0.0  ;;  %v857_v16 = vld [vmem:[#allocation11 + $0x20] sm:$0xff]  }
 0x210   :  { %416 = vadd.xlane.f32.xlu0 %v415_v19  ;;  %v600_v20 = vpop.xlane.xlu0 %599 }
 0x211   :  { %v604_v21 = vmul.f32 0.03125, %v600_v20  ;;  %v414_v22 = vmul.f32 %v1260_v18, %v1260_v18 }
 0x212   :  { %v603_v23 = vpop.xlane.xlu1 %602 }
 0x213   :  { %v1265_v24 = vsub.f32 %v596_v60, %v604_v21  ;;  %v605_v25 = vmul.f32 0.03125, %v603_v23  ;;  %v418_v26 = vsel %vm153_vm1, %v414_v22, 0.0  ;;  %v858_v21 = vld [vmem:[#allocation11 + $0x28] sm:$0xff]   ;;  %v759_v22 = vld [vmem:[#allocation10 + $0x2] ss:$0 sm:$0xff] }
 0x214   :  { %419 = vadd.xlane.f32.xlu1 %v418_v26  ;;  %v740_v26 = vld [vmem:[#allocation13] ss:$0 sm:$0xff] }
 0x215   :  { %v1268_v27 = vsub.f32 %v597_v63, %v605_v25  ;;  %v608_v28 = vmul.f32 %v1265_v24, %v1265_v24 }
 0x217   :  { %v610_v29 = vsel %vm153_vm1, %v608_v28, 0.0  ;;  %v609_v30 = vmul.f32 %v1268_v27, %v1268_v27 }
 0x218   :  { %611 = vadd.xlane.f32.xlu0 %v610_v29 }
 0x219   :  { %v613_v31 = vsel %vm153_vm1, %v609_v30, 0.0 }
 0x21a   :  { %614 = vadd.xlane.f32.xlu1 %v613_v31 }
 0x295   :  { %v225_v34 = vpop.xlane.xlu0 %224 }
 0x296   :  { %v229_v35 = vmul.f32 0.03125, %v225_v34 }
 0x298   :  { %v231_v36 = vadd.f32 1e-05, %v229_v35 }
 0x299   :  { %v228_v37 = vpop.xlane.xlu1 %227 }
 0x29a   :  { %871 = vrsqrt.f32 %v231_v36  ;;  %v230_v38 = vmul.f32 0.03125, %v228_v37 }
 0x29c   :  { %v232_v39 = vadd.f32 1e-05, %v230_v38 }
 0x29d   :  { %v417_v40 = vpop.xlane.xlu0 %416 }
 0x29e   :  { %873 = vrsqrt.f32 %v232_v39  ;;  %v421_v41 = vmul.f32 0.03125, %v417_v40  ;;  %v760_v39 = vld [vmem:[#allocation13 + $0x2] ss:$0 sm:$0xff] }
 0x2a0   :  { %v423_v42 = vadd.f32 1e-05, %v421_v41 }
 0x2a1   :  { %v420_v43 = vpop.xlane.xlu1 %419 }
 0x2a2   :  { %875 = vrsqrt.f32 %v423_v42  ;;  %v422_v44 = vmul.f32 0.03125, %v420_v43 }
 0x2a4   :  { %v872_v45 = vpop.eup %871  ;;  %v424_v46 = vadd.f32 1e-05, %v422_v44 }
 0x2a5   :  { %v235_v47 = vmul.f32 %v872_v45, %v219_v4  ;;  %v612_v48 = vpop.xlane.xlu0 %611 }
 0x2a6   :  { %877 = vrsqrt.f32 %v424_v46  ;;  %v616_v49 = vmul.f32 0.03125, %v612_v48 }
 0x2a7   :  { %v615_v51 = vpop.xlane.xlu1 %614  ;;  %v243_v56 = vmul.f32 %v738_v50, %v235_v47 }
 0x2a8   :  { %v874_v52 = vpop.eup %873  ;;  %v618_v53 = vadd.f32 1e-05, %v616_v49  ;;  %v617_v54 = vmul.f32 0.03125, %v615_v51 }
 0x2a9   :  { %v236_v55 = vmul.f32 %v874_v52, %v220_v8  ;;  %v251_v62 = vadd.f32 %v739_v58, %v243_v56  ;;  %v749_v8 = vld [vmem:[#allocation10 + $0x1] ss:$0 sm:$0xff] }
 0x2aa   :  { %879 = vrsqrt.f32 %v618_v53  ;;  %v619_v57 = vadd.f32 1e-05, %v617_v54 }
 0x2ab   :  { %v244_v59 = vmul.f32 %v738_v50, %v236_v55 }
 0x2ac   :  { %v876_v60 = vpop.eup %875  ;;  %881 = vrsqrt.f32 %v619_v57 }
 0x2ad   :  { %v427_v61 = vmul.f32 %v876_v60, %v1255_v13  ;;  %v252_v63 = vadd.f32 %v739_v58, %v244_v59 }
 0x2af   :  { %v253_v3 = vpack.c.bf16 %v252_v63, %v251_v62  ;;  %v435_v5 = vmul.f32 %v748_v1, %v427_v61 }
 0x2b0   :  { %v878_v4 = vpop.eup %877 }
 0x2b1   :  { %v428_v6 = vmul.f32 %v878_v4, %v1260_v18  ;;  %795 = vmatmul.mubr.msk.bf16.vlgmr.msra.gmra.mrb[0].mxu1 %vm153_vm1, %v253_v3  ;;  %v443_v12 = vadd.f32 %v749_v8, %v435_v5 }
 0x2b2   :  { %807 = vmatpush3.bf16.msra.mxu1 %v855_v2  ;;  %810 = vmatprep.mubr.msk.bf16.mxu1 %vm1081_vm0, %v1080_v0 }
 0x2b3   :  { %v436_v9 = vmul.f32 %v748_v1, %v428_v6  ;;  %808 = vmatprep.subr.bf16.mxu1 %v1080_v0 }
 0x2b4   :  { %v880_v10 = vpop.eup %879 }
 0x2b5   :  { %v622_v11 = vmul.f32 %v880_v10, %v1265_v24  ;;  %v444_v13 = vadd.f32 %v749_v8, %v436_v9 }
 0x2b6   :  { %v882_v14 = vpop.eup %881  ;;  %809 = vmatpush3.bf16.msra.mxu1 %v856_v7 }
 0x2b7   :  { %v623_v17 = vmul.f32 %v882_v14, %v1268_v27  ;;  %v445_v18 = vpack.c.bf16 %v444_v13, %v443_v12  ;;  %822 = vmatprep.subr.bf16.mxu1 %v1080_v0  ;;  %v630_v19 = vmul.f32 %v758_v15, %v622_v11 }
 0x2b9   :  { %v631_v20 = vmul.f32 %v758_v15, %v623_v17  ;;  %811 = vmatmul.mubr.msk.bf16.vlgmr.msra.gmra.mrb[4].mxu1 %vm153_vm1, %v445_v18  ;;  %v638_v24 = vadd.f32 %v759_v22, %v630_v19 }
 0x2ba   :  { %823 = vmatpush3.bf16.msra.mxu1 %v857_v16  ;;  %826 = vmatprep.mubr.msk.bf16.mxu1 %vm1081_vm0, %v1080_v0 }
 0x2bb   :  { %824 = vmatprep.subr.bf16.mxu1 %v1080_v0  ;;  %v639_v23 = vadd.f32 %v759_v22, %v631_v20 }
 0x2bd   :  { %v640_v25 = vpack.c.bf16 %v639_v23, %v638_v24 }
 0x2be   :  { %825 = vmatpush3.bf16.msra.mxu1 %v858_v21 }
 0x2c1   :  { %827 = vmatmul.mubr.msk.bf16.vlgmr.msra.gmra.mrb[8].mxu1 %vm153_vm1, %v640_v25 }
 0x384   :  { %v314_v27 = vpop.f32.mrb[0].mxu1 }
 0x385   :  { %v315_v28 = vadd.f32 %v740_v26, %v314_v27  ;;  %v796_v29 = vpop.f32.mrb[1].mxu1 }
 0x386   :  { %v317_v30 = vpop.f32.mrb[2].mxu1 }
 0x387   :  { %321 = vst [vmem:[#allocation14] sm:$0xff] %v315_v28  ;;  %v318_v31 = vadd.f32 %v740_v26, %v317_v30  ;;  %v797_v32 = vpop.f32.mrb[3].mxu1 }
 0x389   :  { %322 = vst [vmem:[#allocation14 + $0x8] sm:$0xff] %v318_v31 }
 0x38c   :  { %v508_v34 = vpop.f32.mrb[4].mxu1 }
 0x38d   :  { %v509_v35 = vadd.f32 %v750_v33, %v508_v34  ;;  %v812_v36 = vpop.f32.mrb[5].mxu1 }
 0x38e   :  { %v511_v0 = vpop.f32.mrb[6].mxu1 }
 0x38f   :  { %516 = vst [vmem:[#allocation14 + $0x10] sm:$0xff] %v509_v35  ;;  %v512_v37 = vadd.f32 %v750_v33, %v511_v0  ;;  %v813_v38 = vpop.f32.mrb[7].mxu1 }
 0x391   :  { %517 = vst [vmem:[#allocation14 + $0x18] sm:$0xff] %v512_v37 }
 0x394   :  { %v703_v40 = vpop.f32.mrb[8].mxu1 }
 0x395   :  { %v704_v41 = vadd.f32 %v760_v39, %v703_v40  ;;  %v828_v42 = vpop.f32.mrb[9].mxu1 }
 0x396   :  { %v706_v43 = vpop.f32.mrb[10].mxu1 }
 0x397   :  { %711 = vst [vmem:[#allocation14 + $0x20] sm:$0xff] %v704_v41  ;;  %v707_v44 = vadd.f32 %v760_v39, %v706_v43  ;;  %v829_v45 = vpop.f32.mrb[11].mxu1 }
 0x399   :  { %712 = vst [vmem:[#allocation14 + $0x28] sm:$0xff] %v707_v44 }
 0x39a   :  { %1048 = shalt.err (!%p1045_p4)
}
 0x39b   :  { %s1049_s21 = scalar_lea.hbm %s1311_s7, 768 }
 0x39c   :  { %p1050_p5 = scmp.ne.s32.totalorder %s1311_s7, %s1049_s21  ;;  %p1053_p6 = scmp.lt.u32.totalorder %s1049_s21, %s1311_s7 }
 0x39e   :  { %p1055_p7 = pnand %p1053_p6, %p1050_p5 }
 0x3a0   :  { %1058 = shalt.err (!%p1055_p7)
}
 0x3a1   :  { %s1083_s25 = smov 128   ;;  %s1084_s29 = smov 8  }
 0x3a2   :  { %724 = dma.vmem_to_hbm [thread:$0]  %s719_s27, 768, %s1311_s7, [#allocation4], %s1083_s25, %s1083_s25, %s1084_s29  }
 0x3a3   :  { %1067 = dma.done.wait [#allocation4], 768  }
 0x3a4   :  { %1068 = vsyncadd [#allocation4], 4294966528 }
 0x3a5   :  { %728 = vsyncpa [#allocation3], 1 }
 0x3a6   :  { %729 = vsyncpa [#allocation6], 1 }
 0x3a7   :  { %730 = vsyncpa [#allocation9], 1 }
 0x3a8   :  { %731 = vsyncpa [#allocation12], 1 }
 0x3a9   :  { %732 = vsyncpa [#allocation4], 1 }

</bundles_post_ra>
